<compile_context>
chip_gen: v5e
topology: v5e:2x2
jax: 0.10.0
libtpu: 0.0.40
codegen_flags: <defaults>
</compile_context>

<pallas_src>
import math
from functools import partial

import jax
import jax.numpy as jnp
from jax.experimental import pallas as pl
from jax.experimental.pallas import tpu as pltpu


# ----------------------------------------------------------------------------
# In-kernel math helper (operates on loaded jnp values, one batch element)
# ----------------------------------------------------------------------------
def _mha_ln(xq, xk, xv, resid, wqT, wkT, wvT, woT, bq, bk, bv, bo, gamma, beta,
            *, num_heads, head_dim, eps):
    """MHA(xq, xk, xv) + residual + LayerNorm for one batch element.

    xq/resid: (L, E); xk/xv: (S, E).  wqT/bq already carry the 1/sqrt(head_dim)
    scale.  Returns (y (L, E), head-averaged attention weights (L, S)).
    """
    L, E = xq.shape
    S = xk.shape[0]

    # Fused full-E projections: 3 matmuls instead of 3 * num_heads tiny ones.
    Q = jnp.dot(xq, wqT, preferred_element_type=jnp.float32) + bq   # (L, E), pre-scaled
    K = jnp.dot(xk, wkT, preferred_element_type=jnp.float32) + bk   # (S, E)
    V = jnp.dot(xv, wvT, preferred_element_type=jnp.float32) + bv   # (S, E)

    o = jnp.zeros((L, E), jnp.float32)
    w_acc = jnp.zeros((L, S), jnp.float32)
    for h in range(num_heads):                       # static unroll, num_heads small
        sl = slice(h * head_dim, (h + 1) * head_dim)
        Qh, Kh, Vh = Q[:, sl], K[:, sl], V[:, sl]
        # scores: contract last dims directly (no explicit transpose of Kh)
        s = jnp.einsum("ld,sd->ls", Qh, Kh, preferred_element_type=jnp.float32)
        s = s - jnp.max(s, axis=-1, keepdims=True)
        p = jnp.exp(s)
        p = p * pl.reciprocal(jnp.sum(p, axis=-1, keepdims=True), approx=True)
        w_acc = w_acc + p
        attn_h = jnp.dot(p, Vh, preferred_element_type=jnp.float32)         # (L, Dh)
        # per-head out-proj contribution (== concat-heads @ Wo^T)
        o = o + jnp.dot(attn_h, woT[sl, :], preferred_element_type=jnp.float32)

    x = o + bo + resid                      # dropout == identity (eval mode)
    mu = jnp.mean(x, axis=-1, keepdims=True)
    var = jnp.mean((x - mu) ** 2, axis=-1, keepdims=True)
    y = (x - mu) * jax.lax.rsqrt(var + eps) * gamma + beta
    return y, w_acc * (1.0 / num_heads)


# ----------------------------------------------------------------------------
# Pallas kernels
# ----------------------------------------------------------------------------
def cross_attn2_kernel(q_ref, k_ref, v_ref,
                       wqT_ref, wkT_ref, wvT_ref, woT_ref,
                       bq_ref, bk_ref, bv_ref, bo_ref,
                       gamma_ref, beta_ref, alpha_ref,
                       out_ref, w1_ref, w2_ref,
                       *, num_heads, head_dim, eps):
    """Fused: ca1 = LN(MHA(q,k,v)+q), ca2 = LN(MHA(k,q,q)+k), blend with alpha.

    Blocks: q_ref (1,L,E), k_ref/v_ref (1,S,E); weights full; alpha in SMEM (1,).
    Outputs: out_ref (1,L,E), w1_ref (1,L,S), w2_ref (1,S,L).
    """
    q = q_ref[0].astype(jnp.float32)
    k = k_ref[0].astype(jnp.float32)
    v = v_ref[0].astype(jnp.float32)
    wqT, wkT, wvT, woT = wqT_ref[...], wkT_ref[...], wvT_ref[...], woT_ref[...]
    bq, bk, bv, bo = bq_ref[...], bk_ref[...], bv_ref[...], bo_ref[...]
    gamma, beta = gamma_ref[...], beta_ref[...]

    ca1, w1 = _mha_ln(q, k, v, q, wqT, wkT, wvT, woT, bq, bk, bv, bo, gamma, beta,
                      num_heads=num_heads, head_dim=head_dim, eps=eps)
    ca2, w2 = _mha_ln(k, q, q, k, wqT, wkT, wvT, woT, bq, bk, bv, bo, gamma, beta,
                      num_heads=num_heads, head_dim=head_dim, eps=eps)

    alpha = alpha_ref[0]
    out_ref[0] = (alpha * ca1 + (1.0 - alpha) * ca2).astype(out_ref.dtype)
    w1_ref[0] = w1.astype(w1_ref.dtype)
    w2_ref[0] = w2.astype(w2_ref.dtype)


def cross_attn1_kernel(q_ref, k_ref, v_ref,
                       wqT_ref, wkT_ref, wvT_ref, woT_ref,
                       bq_ref, bk_ref, bv_ref, bo_ref,
                       gamma_ref, beta_ref,
                       out_ref, w1_ref,
                       *, num_heads, head_dim, eps):
    """Single block: out = LN(MHA(q,k,v) + q)."""
    q = q_ref[0].astype(jnp.float32)
    k = k_ref[0].astype(jnp.float32)
    v = v_ref[0].astype(jnp.float32)
    ca1, w1 = _mha_ln(q, k, v, q,
                      wqT_ref[...], wkT_ref[...], wvT_ref[...], woT_ref[...],
                      bq_ref[...], bk_ref[...], bv_ref[...], bo_ref[...],
                      gamma_ref[...], beta_ref[...],
                      num_heads=num_heads, head_dim=head_dim, eps=eps)
    out_ref[0] = ca1.astype(out_ref.dtype)
    w1_ref[0] = w1.astype(w1_ref.dtype)


# ----------------------------------------------------------------------------
# Wrapper
# ----------------------------------------------------------------------------
def cross_attention_forward(query, key, value, params, num_heads, num_cross_att,
                            eps=1e-5):
    """Mirrors CrossAttention.forward (eval mode).

    query: (L, N, E); key/value: (S, N, E)   [nn.MultiheadAttention default layout]
    returns (out (L, N, E), weights_1 (N, L, S), weights_2 (N, S, L) or 'weights_2')
    """
    L, N, E = query.shape
    S = key.shape[0]
    Dh = E // num_heads
    scale = 1.0 / math.sqrt(Dh)
    f32 = jnp.float32

    # --- one-time weight layout plumbing (never re-done inside the kernel) ---
    wqT = (params["wq"].astype(f32) * scale).T          # (E, E), scale folded in
    wkT = params["wk"].astype(f32).T                    # (E, E)
    wvT = params["wv"].astype(f32).T                    # (E, E)
    woT = params["wo"].astype(f32).T                    # (E, E)
    bq = (params["bq"].astype(f32) * scale).reshape(1, E)
    bk = params["bk"].astype(f32).reshape(1, E)
    bv = params["bv"].astype(f32).reshape(1, E)
    bo = params["bo"].astype(f32).reshape(1, E)
    gamma = params["gamma"].astype(f32).reshape(1, E)
    beta = params["beta"].astype(f32).reshape(1, E)

    # Batch-major activations so each grid step sees a contiguous (1, seq, E) slab
    # whose last two block dims equal the full array dims (clean (8,128) tiling).
    qb = jnp.transpose(query, (1, 0, 2)).astype(f32)    # (N, L, E)
    kb = jnp.transpose(key, (1, 0, 2)).astype(f32)      # (N, S, E)
    vb = jnp.transpose(value, (1, 0, 2)).astype(f32)    # (N, S, E)

    const = lambda shape: pl.BlockSpec(shape, lambda n, _s=shape: (0,) * len(_s))
    # Constant block indices -> weights are revisited, not re-tiled, across the grid.
    weight_specs = [const((E, E))] * 4 + [const((1, E))] * 6
    act_in_specs = [pl.BlockSpec((1, L, E), lambda n: (n, 0, 0)),
                    pl.BlockSpec((1, S, E), lambda n: (n, 0, 0)),
                    pl.BlockSpec((1, S, E), lambda n: (n, 0, 0))]

    if num_cross_att == 1:
        kernel = partial(cross_attn1_kernel, num_heads=num_heads, head_dim=Dh, eps=eps)
        out, w1 = pl.pallas_call(
            kernel,
            out_shape=(jax.ShapeDtypeStruct((N, L, E), f32),
                       jax.ShapeDtypeStruct((N, L, S), f32)),
            grid=(N,),
            in_specs=act_in_specs + weight_specs,
            out_specs=(pl.BlockSpec((1, L, E), lambda n: (n, 0, 0)),
                       pl.BlockSpec((1, L, S), lambda n: (n, 0, 0))),
            compiler_params=pltpu.CompilerParams(dimension_semantics=("parallel",)),
        )(qb, kb, vb, wqT, wkT, wvT, woT, bq, bk, bv, bo, gamma, beta)
        return jnp.transpose(out, (1, 0, 2)), w1, "weights_2"

    assert L == S, "blend path (num_cross_att != 1) requires tgt_len == src_len"
    alpha = params["parameter"].reshape((1,)).astype(f32)

    kernel = partial(cross_attn2_kernel, num_heads=num_heads, head_dim=Dh, eps=eps)
    out, w1, w2 = pl.pallas_call(
        kernel,
        out_shape=(jax.ShapeDtypeStruct((N, L, E), f32),
                   jax.ShapeDtypeStruct((N, L, S), f32),
                   jax.ShapeDtypeStruct((N, S, L), f32)),
        grid=(N,),
        in_specs=act_in_specs + weight_specs
                 + [pl.BlockSpec(memory_space=pltpu.MemorySpace.SMEM)],   # alpha
        out_specs=(pl.BlockSpec((1, L, E), lambda n: (n, 0, 0)),
                   pl.BlockSpec((1, L, S), lambda n: (n, 0, 0)),
                   pl.BlockSpec((1, S, L), lambda n: (n, 0, 0))),
        compiler_params=pltpu.CompilerParams(dimension_semantics=("parallel",)),
    )(qb, kb, vb, wqT, wkT, wvT, woT, bq, bk, bv, bo, gamma, beta, alpha)

    return jnp.transpose(out, (1, 0, 2)), w1, w2


# ----------------------------------------------------------------------------
# Pure-JAX reference (for correctness check)
# ----------------------------------------------------------------------------
def _mha_ref(query, key, value, p, num_heads):
    L, N, E = query.shape
    S = key.shape[0]
    Dh = E // num_heads
    Q = query @ p["wq"].T + p["bq"]
    K = key @ p["wk"].T + p["bk"]
    V = value @ p["wv"].T + p["bv"]
    Qh = Q.reshape(L, N, num_heads, Dh).transpose(1, 2, 0, 3)
    Kh = K.reshape(S, N, num_heads, Dh).transpose(1, 2, 0, 3)
    Vh = V.reshape(S, N, num_heads, Dh).transpose(1, 2, 0, 3)
    s = jnp.einsum("nhld,nhsd->nhls", Qh, Kh) / math.sqrt(Dh)
    w = jax.nn.softmax(s, axis=-1)
    a = jnp.einsum("nhls,nhsd->nhld", w, Vh).transpose(2, 0, 1, 3).reshape(L, N, E)
    o = a @ p["wo"].T + p["bo"]
    return o, w.mean(axis=1)


def _ln_ref(x, g, b, eps=1e-5):
    mu = x.mean(-1, keepdims=True)
    var = ((x - mu) ** 2).mean(-1, keepdims=True)
    return (x - mu) / jnp.sqrt(var + eps) * g + b


def _cross_attention_ref(query, key, value, p, num_heads, num_cross_att):
    o1, w1 = _mha_ref(query, key, value, p, num_heads)
    ca1 = _ln_ref(o1 + query, p["gamma"], p["beta"])
    if num_cross_att == 1:
        return ca1, w1, "weights_2"
    o2, w2 = _mha_ref(key, query, query, p, num_heads)
    ca2 = _ln_ref(o2 + key, p["gamma"], p["beta"])
    a = p["parameter"]
    return a * ca1 + (1.0 - a) * ca2, w1, w2


# ----------------------------------------------------------------------------
# main
# ----------------------------------------------------------------------------
if __name__ == "__main__":
    # small shapes: tgt_len = src_len = 8 (required for the blend path),
    # batch = 2, embed_dim = 32, num_heads = 4 (head_dim = 8)
    L = S = 8
    N = 2
    E = 32
    H = 4
    NUM_CROSS_ATT = 2

    key0 = jax.random.PRNGKey(0)
    ks = jax.random.split(key0, 12)

    params = {
        "wq": 0.1 * jax.random.normal(ks[0], (E, E), jnp.float32),
        "wk": 0.1 * jax.random.normal(ks[1], (E, E), jnp.float32),
        "wv": 0.1 * jax.random.normal(ks[2], (E, E), jnp.float32),
        "bq": 0.1 * jax.random.normal(ks[3], (E,), jnp.float32),
        "bk": 0.1 * jax.random.normal(ks[4], (E,), jnp.float32),
        "bv": 0.1 * jax.random.normal(ks[5], (E,), jnp.float32),
        "wo": 0.1 * jax.random.normal(ks[6], (E, E), jnp.float32),
        "bo": 0.1 * jax.random.normal(ks[7], (E,), jnp.float32),
        "gamma": jnp.ones((E,), jnp.float32),
        "beta": jnp.zeros((E,), jnp.float32),
        "parameter": jax.random.uniform(ks[8], (1,), jnp.float32),  # torch.rand(1)
    }

    query = jax.random.normal(ks[9], (L, N, E), jnp.float32)
    key_ = jax.random.normal(ks[10], (S, N, E), jnp.float32)
    value = jax.random.normal(ks[11], (S, N, E), jnp.float32)

    fwd = jax.jit(partial(cross_attention_forward,
                          num_heads=H, num_cross_att=NUM_CROSS_ATT))
    combined, w1, w2 = fwd(query, key_, value, params)
    jax.block_until_ready((combined, w1, w2))

    # correctness check against a pure-JAX reference
    # (tolerances slightly relaxed because the softmax denominator uses the
    #  hardware approximate reciprocal, pl.reciprocal(approx=True))
    ref_c, ref_w1, ref_w2 = _cross_attention_ref(
        query, key_, value, params, num_heads=H, num_cross_att=NUM_CROSS_ATT)
    assert combined.shape == (L, N, E) and w1.shape == (N, L, S) and w2.shape == (N, S, L)
    assert jnp.allclose(combined, ref_c, rtol=5e-3, atol=5e-3)
    assert jnp.allclose(w1, ref_w1, rtol=5e-3, atol=1e-3)
    assert jnp.allclose(w2, ref_w2, rtol=5e-3, atol=1e-3)

    print("KERNEL_OK")
</pallas_src>

<mosaic_0001>
module attributes {stable_mosaic.version = 11 : i64} {
  func.func @cross_attn2_kernel(%arg0: i32, %arg1: memref<1x8x32xf32, #tpu.memory_space<vmem>>, %arg2: memref<1x8x32xf32, #tpu.memory_space<vmem>>, %arg3: memref<1x8x32xf32, #tpu.memory_space<vmem>>, %arg4: memref<32x32xf32, #tpu.memory_space<vmem>>, %arg5: memref<32x32xf32, #tpu.memory_space<vmem>>, %arg6: memref<32x32xf32, #tpu.memory_space<vmem>>, %arg7: memref<32x32xf32, #tpu.memory_space<vmem>>, %arg8: memref<1x32xf32, #tpu.memory_space<vmem>>, %arg9: memref<1x32xf32, #tpu.memory_space<vmem>>, %arg10: memref<1x32xf32, #tpu.memory_space<vmem>>, %arg11: memref<1x32xf32, #tpu.memory_space<vmem>>, %arg12: memref<1x32xf32, #tpu.memory_space<vmem>>, %arg13: memref<1x32xf32, #tpu.memory_space<vmem>>, %arg14: memref<1xf32, #tpu.memory_space<smem>>, %arg15: memref<1x8x32xf32, #tpu.memory_space<vmem>>, %arg16: memref<1x8x8xf32, #tpu.memory_space<vmem>>, %arg17: memref<1x8x8xf32, #tpu.memory_space<vmem>>) attributes {dimension_semantics = [#tpu.dimension_semantics<parallel>], iteration_bounds = array<i64: 2>, scalar_prefetch = 0 : i64, scratch_operands = 0 : i64, tpu.core_type = #tpu.core_type<tc>, window_params = [{transform_indices = @transform_0, window_bounds = array<i64: 1, 8, 32>}, {transform_indices = @transform_1, window_bounds = array<i64: 1, 8, 32>}, {transform_indices = @transform_2, window_bounds = array<i64: 1, 8, 32>}, {pipeline_mode = #tpu.pipeline_mode<synchronous>, transform_indices = @transform_3, window_bounds = array<i64: 32, 32>}, {pipeline_mode = #tpu.pipeline_mode<synchronous>, transform_indices = @transform_4, window_bounds = array<i64: 32, 32>}, {pipeline_mode = #tpu.pipeline_mode<synchronous>, transform_indices = @transform_5, window_bounds = array<i64: 32, 32>}, {pipeline_mode = #tpu.pipeline_mode<synchronous>, transform_indices = @transform_6, window_bounds = array<i64: 32, 32>}, {pipeline_mode = #tpu.pipeline_mode<synchronous>, transform_indices = @transform_7, window_bounds = array<i64: 1, 32>}, {pipeline_mode = #tpu.pipeline_mode<synchronous>, transform_indices = @transform_8, window_bounds = array<i64: 1, 32>}, {pipeline_mode = #tpu.pipeline_mode<synchronous>, transform_indices = @transform_9, window_bounds = array<i64: 1, 32>}, {pipeline_mode = #tpu.pipeline_mode<synchronous>, transform_indices = @transform_10, window_bounds = array<i64: 1, 32>}, {pipeline_mode = #tpu.pipeline_mode<synchronous>, transform_indices = @transform_11, window_bounds = array<i64: 1, 32>}, {pipeline_mode = #tpu.pipeline_mode<synchronous>, transform_indices = @transform_12, window_bounds = array<i64: 1, 32>}, {transform_indices = @transform_13, window_bounds = array<i64: 1>}, {transform_indices = @transform_14, window_bounds = array<i64: 1, 8, 32>}, {transform_indices = @transform_15, window_bounds = array<i64: 1, 8, 8>}, {transform_indices = @transform_16, window_bounds = array<i64: 1, 8, 8>}]} {
    %c0 = arith.constant 0 : index
    %c0_0 = arith.constant 0 : index
    %c0_1 = arith.constant 0 : index
    %0 = vector.load %arg1[%c0, %c0_0, %c0_1] : memref<1x8x32xf32, #tpu.memory_space<vmem>>, vector<1x8x32xf32>
    %1 = vector.shape_cast %0 : vector<1x8x32xf32> to vector<8x32xf32>
    %c0_2 = arith.constant 0 : index
    %c0_3 = arith.constant 0 : index
    %c0_4 = arith.constant 0 : index
    %2 = vector.load %arg2[%c0_2, %c0_3, %c0_4] : memref<1x8x32xf32, #tpu.memory_space<vmem>>, vector<1x8x32xf32>
    %3 = vector.shape_cast %2 : vector<1x8x32xf32> to vector<8x32xf32>
    %c0_5 = arith.constant 0 : index
    %c0_6 = arith.constant 0 : index
    %c0_7 = arith.constant 0 : index
    %4 = vector.load %arg3[%c0_5, %c0_6, %c0_7] : memref<1x8x32xf32, #tpu.memory_space<vmem>>, vector<1x8x32xf32>
    %5 = vector.shape_cast %4 : vector<1x8x32xf32> to vector<8x32xf32>
    %c0_8 = arith.constant 0 : index
    %c0_9 = arith.constant 0 : index
    %6 = vector.load %arg4[%c0_8, %c0_9] : memref<32x32xf32, #tpu.memory_space<vmem>>, vector<32x32xf32>
    %c0_10 = arith.constant 0 : index
    %c0_11 = arith.constant 0 : index
    %7 = vector.load %arg5[%c0_10, %c0_11] : memref<32x32xf32, #tpu.memory_space<vmem>>, vector<32x32xf32>
    %c0_12 = arith.constant 0 : index
    %c0_13 = arith.constant 0 : index
    %8 = vector.load %arg6[%c0_12, %c0_13] : memref<32x32xf32, #tpu.memory_space<vmem>>, vector<32x32xf32>
    %c0_14 = arith.constant 0 : index
    %c0_15 = arith.constant 0 : index
    %9 = vector.load %arg7[%c0_14, %c0_15] : memref<32x32xf32, #tpu.memory_space<vmem>>, vector<32x32xf32>
    %c0_16 = arith.constant 0 : index
    %c0_17 = arith.constant 0 : index
    %10 = vector.load %arg8[%c0_16, %c0_17] : memref<1x32xf32, #tpu.memory_space<vmem>>, vector<1x32xf32>
    %c0_18 = arith.constant 0 : index
    %c0_19 = arith.constant 0 : index
    %11 = vector.load %arg9[%c0_18, %c0_19] : memref<1x32xf32, #tpu.memory_space<vmem>>, vector<1x32xf32>
    %c0_20 = arith.constant 0 : index
    %c0_21 = arith.constant 0 : index
    %12 = vector.load %arg10[%c0_20, %c0_21] : memref<1x32xf32, #tpu.memory_space<vmem>>, vector<1x32xf32>
    %c0_22 = arith.constant 0 : index
    %c0_23 = arith.constant 0 : index
    %13 = vector.load %arg11[%c0_22, %c0_23] : memref<1x32xf32, #tpu.memory_space<vmem>>, vector<1x32xf32>
    %c0_24 = arith.constant 0 : index
    %c0_25 = arith.constant 0 : index
    %14 = vector.load %arg12[%c0_24, %c0_25] : memref<1x32xf32, #tpu.memory_space<vmem>>, vector<1x32xf32>
    %c0_26 = arith.constant 0 : index
    %c0_27 = arith.constant 0 : index
    %15 = vector.load %arg13[%c0_26, %c0_27] : memref<1x32xf32, #tpu.memory_space<vmem>>, vector<1x32xf32>
    %cst = arith.constant dense<0.000000e+00> : vector<8x32xf32>
    %16 = tpu.matmul %1, %6, %cst {dimension_numbers = #tpu.dot_dimension_numbers<[1], [0], [0], [1], [0, 0, 1, 1], [], []>} : vector<8x32xf32>, vector<32x32xf32>, vector<8x32xf32> -> vector<8x32xf32>
    %17 = vector.broadcast %10 : vector<1x32xf32> to vector<8x32xf32>
    %18 = arith.addf %16, %17 : vector<8x32xf32>
    %cst_28 = arith.constant dense<0.000000e+00> : vector<8x32xf32>
    %19 = tpu.matmul %3, %7, %cst_28 {dimension_numbers = #tpu.dot_dimension_numbers<[1], [0], [0], [1], [0, 0, 1, 1], [], []>} : vector<8x32xf32>, vector<32x32xf32>, vector<8x32xf32> -> vector<8x32xf32>
    %20 = vector.broadcast %11 : vector<1x32xf32> to vector<8x32xf32>
    %21 = arith.addf %19, %20 : vector<8x32xf32>
    %cst_29 = arith.constant dense<0.000000e+00> : vector<8x32xf32>
    %22 = tpu.matmul %5, %8, %cst_29 {dimension_numbers = #tpu.dot_dimension_numbers<[1], [0], [0], [1], [0, 0, 1, 1], [], []>} : vector<8x32xf32>, vector<32x32xf32>, vector<8x32xf32> -> vector<8x32xf32>
    %23 = vector.broadcast %12 : vector<1x32xf32> to vector<8x32xf32>
    %24 = arith.addf %22, %23 : vector<8x32xf32>
    %cst_30 = arith.constant 0.000000e+00 : f32
    %25 = vector.broadcast %cst_30 : f32 to vector<8x32xf32>
    %cst_31 = arith.constant 0.000000e+00 : f32
    %26 = vector.broadcast %cst_31 : f32 to vector<8x8xf32>
    %27 = vector.extract_strided_slice %18 {offsets = [0, 0], sizes = [8, 8], strides = [1, 1]} : vector<8x32xf32> to vector<8x8xf32>
    %28 = vector.extract_strided_slice %21 {offsets = [0, 0], sizes = [8, 8], strides = [1, 1]} : vector<8x32xf32> to vector<8x8xf32>
    %29 = vector.extract_strided_slice %24 {offsets = [0, 0], sizes = [8, 8], strides = [1, 1]} : vector<8x32xf32> to vector<8x8xf32>
    "tpu.trace_start"() <{level = 10 : i32, message = "ld,sd->ls"}> : () -> ()
    %cst_32 = arith.constant dense<0.000000e+00> : vector<8x8xf32>
    %30 = tpu.matmul %27, %28, %cst_32 {dimension_numbers = #tpu.dot_dimension_numbers<[1], [1], [0], [0], [0, 0, 1, 0], [], []>} : vector<8x8xf32>, vector<8x8xf32>, vector<8x8xf32> -> vector<8x8xf32>
    "tpu.trace_stop"() : () -> ()
    %cst_33 = arith.constant dense<0xFF800000> : vector<8xf32>
    %31 = vector.multi_reduction <maximumf>, %30, %cst_33 [1] : vector<8x8xf32> to vector<8xf32>
    %32 = vector.shape_cast %31 : vector<8xf32> to vector<8x1xf32>
    %33 = vector.broadcast %32 : vector<8x1xf32> to vector<8x8xf32>
    %34 = arith.subf %30, %33 : vector<8x8xf32>
    %35 = math.exp %34 : vector<8x8xf32>
    %cst_34 = arith.constant dense<0.000000e+00> : vector<8xf32>
    %36 = vector.multi_reduction <add>, %35, %cst_34 [1] : vector<8x8xf32> to vector<8xf32>
    %37 = vector.shape_cast %36 : vector<8xf32> to vector<8x1xf32>
    %38 = tpu.reciprocal %37 {approx = true} : vector<8x1xf32> -> vector<8x1xf32>
    %39 = vector.broadcast %38 : vector<8x1xf32> to vector<8x8xf32>
    %40 = arith.mulf %35, %39 : vector<8x8xf32>
    %41 = arith.addf %26, %40 : vector<8x8xf32>
    %cst_35 = arith.constant dense<0.000000e+00> : vector<8x8xf32>
    %42 = tpu.matmul %40, %29, %cst_35 {dimension_numbers = #tpu.dot_dimension_numbers<[1], [0], [0], [1], [0, 0, 1, 1], [], []>} : vector<8x8xf32>, vector<8x8xf32>, vector<8x8xf32> -> vector<8x8xf32>
    %43 = vector.extract_strided_slice %9 {offsets = [0, 0], sizes = [8, 32], strides = [1, 1]} : vector<32x32xf32> to vector<8x32xf32>
    %cst_36 = arith.constant dense<0.000000e+00> : vector<8x32xf32>
    %44 = tpu.matmul %42, %43, %cst_36 {dimension_numbers = #tpu.dot_dimension_numbers<[1], [0], [0], [1], [0, 0, 1, 1], [], []>} : vector<8x8xf32>, vector<8x32xf32>, vector<8x32xf32> -> vector<8x32xf32>
    %45 = arith.addf %25, %44 : vector<8x32xf32>
    %46 = vector.extract_strided_slice %18 {offsets = [0, 8], sizes = [8, 8], strides = [1, 1]} : vector<8x32xf32> to vector<8x8xf32>
    %47 = vector.extract_strided_slice %21 {offsets = [0, 8], sizes = [8, 8], strides = [1, 1]} : vector<8x32xf32> to vector<8x8xf32>
    %48 = vector.extract_strided_slice %24 {offsets = [0, 8], sizes = [8, 8], strides = [1, 1]} : vector<8x32xf32> to vector<8x8xf32>
    "tpu.trace_start"() <{level = 10 : i32, message = "ld,sd->ls"}> : () -> ()
    %cst_37 = arith.constant dense<0.000000e+00> : vector<8x8xf32>
    %49 = tpu.matmul %46, %47, %cst_37 {dimension_numbers = #tpu.dot_dimension_numbers<[1], [1], [0], [0], [0, 0, 1, 0], [], []>} : vector<8x8xf32>, vector<8x8xf32>, vector<8x8xf32> -> vector<8x8xf32>
    "tpu.trace_stop"() : () -> ()
    %cst_38 = arith.constant dense<0xFF800000> : vector<8xf32>
    %50 = vector.multi_reduction <maximumf>, %49, %cst_38 [1] : vector<8x8xf32> to vector<8xf32>
    %51 = vector.shape_cast %50 : vector<8xf32> to vector<8x1xf32>
    %52 = vector.broadcast %51 : vector<8x1xf32> to vector<8x8xf32>
    %53 = arith.subf %49, %52 : vector<8x8xf32>
    %54 = math.exp %53 : vector<8x8xf32>
    %cst_39 = arith.constant dense<0.000000e+00> : vector<8xf32>
    %55 = vector.multi_reduction <add>, %54, %cst_39 [1] : vector<8x8xf32> to vector<8xf32>
    %56 = vector.shape_cast %55 : vector<8xf32> to vector<8x1xf32>
    %57 = tpu.reciprocal %56 {approx = true} : vector<8x1xf32> -> vector<8x1xf32>
    %58 = vector.broadcast %57 : vector<8x1xf32> to vector<8x8xf32>
    %59 = arith.mulf %54, %58 : vector<8x8xf32>
    %60 = arith.addf %41, %59 : vector<8x8xf32>
    %cst_40 = arith.constant dense<0.000000e+00> : vector<8x8xf32>
    %61 = tpu.matmul %59, %48, %cst_40 {dimension_numbers = #tpu.dot_dimension_numbers<[1], [0], [0], [1], [0, 0, 1, 1], [], []>} : vector<8x8xf32>, vector<8x8xf32>, vector<8x8xf32> -> vector<8x8xf32>
    %62 = vector.extract_strided_slice %9 {offsets = [8, 0], sizes = [8, 32], strides = [1, 1]} : vector<32x32xf32> to vector<8x32xf32>
    %cst_41 = arith.constant dense<0.000000e+00> : vector<8x32xf32>
    %63 = tpu.matmul %61, %62, %cst_41 {dimension_numbers = #tpu.dot_dimension_numbers<[1], [0], [0], [1], [0, 0, 1, 1], [], []>} : vector<8x8xf32>, vector<8x32xf32>, vector<8x32xf32> -> vector<8x32xf32>
    %64 = arith.addf %45, %63 : vector<8x32xf32>
    %65 = vector.extract_strided_slice %18 {offsets = [0, 16], sizes = [8, 8], strides = [1, 1]} : vector<8x32xf32> to vector<8x8xf32>
    %66 = vector.extract_strided_slice %21 {offsets = [0, 16], sizes = [8, 8], strides = [1, 1]} : vector<8x32xf32> to vector<8x8xf32>
    %67 = vector.extract_strided_slice %24 {offsets = [0, 16], sizes = [8, 8], strides = [1, 1]} : vector<8x32xf32> to vector<8x8xf32>
    "tpu.trace_start"() <{level = 10 : i32, message = "ld,sd->ls"}> : () -> ()
    %cst_42 = arith.constant dense<0.000000e+00> : vector<8x8xf32>
    %68 = tpu.matmul %65, %66, %cst_42 {dimension_numbers = #tpu.dot_dimension_numbers<[1], [1], [0], [0], [0, 0, 1, 0], [], []>} : vector<8x8xf32>, vector<8x8xf32>, vector<8x8xf32> -> vector<8x8xf32>
    "tpu.trace_stop"() : () -> ()
    %cst_43 = arith.constant dense<0xFF800000> : vector<8xf32>
    %69 = vector.multi_reduction <maximumf>, %68, %cst_43 [1] : vector<8x8xf32> to vector<8xf32>
    %70 = vector.shape_cast %69 : vector<8xf32> to vector<8x1xf32>
    %71 = vector.broadcast %70 : vector<8x1xf32> to vector<8x8xf32>
    %72 = arith.subf %68, %71 : vector<8x8xf32>
    %73 = math.exp %72 : vector<8x8xf32>
    %cst_44 = arith.constant dense<0.000000e+00> : vector<8xf32>
    %74 = vector.multi_reduction <add>, %73, %cst_44 [1] : vector<8x8xf32> to vector<8xf32>
    %75 = vector.shape_cast %74 : vector<8xf32> to vector<8x1xf32>
    %76 = tpu.reciprocal %75 {approx = true} : vector<8x1xf32> -> vector<8x1xf32>
    %77 = vector.broadcast %76 : vector<8x1xf32> to vector<8x8xf32>
    %78 = arith.mulf %73, %77 : vector<8x8xf32>
    %79 = arith.addf %60, %78 : vector<8x8xf32>
    %cst_45 = arith.constant dense<0.000000e+00> : vector<8x8xf32>
    %80 = tpu.matmul %78, %67, %cst_45 {dimension_numbers = #tpu.dot_dimension_numbers<[1], [0], [0], [1], [0, 0, 1, 1], [], []>} : vector<8x8xf32>, vector<8x8xf32>, vector<8x8xf32> -> vector<8x8xf32>
    %81 = vector.extract_strided_slice %9 {offsets = [16, 0], sizes = [8, 32], strides = [1, 1]} : vector<32x32xf32> to vector<8x32xf32>
    %cst_46 = arith.constant dense<0.000000e+00> : vector<8x32xf32>
    %82 = tpu.matmul %80, %81, %cst_46 {dimension_numbers = #tpu.dot_dimension_numbers<[1], [0], [0], [1], [0, 0, 1, 1], [], []>} : vector<8x8xf32>, vector<8x32xf32>, vector<8x32xf32> -> vector<8x32xf32>
    %83 = arith.addf %64, %82 : vector<8x32xf32>
    %84 = vector.extract_strided_slice %18 {offsets = [0, 24], sizes = [8, 8], strides = [1, 1]} : vector<8x32xf32> to vector<8x8xf32>
    %85 = vector.extract_strided_slice %21 {offsets = [0, 24], sizes = [8, 8], strides = [1, 1]} : vector<8x32xf32> to vector<8x8xf32>
    %86 = vector.extract_strided_slice %24 {offsets = [0, 24], sizes = [8, 8], strides = [1, 1]} : vector<8x32xf32> to vector<8x8xf32>
    "tpu.trace_start"() <{level = 10 : i32, message = "ld,sd->ls"}> : () -> ()
    %cst_47 = arith.constant dense<0.000000e+00> : vector<8x8xf32>
    %87 = tpu.matmul %84, %85, %cst_47 {dimension_numbers = #tpu.dot_dimension_numbers<[1], [1], [0], [0], [0, 0, 1, 0], [], []>} : vector<8x8xf32>, vector<8x8xf32>, vector<8x8xf32> -> vector<8x8xf32>
    "tpu.trace_stop"() : () -> ()
    %cst_48 = arith.constant dense<0xFF800000> : vector<8xf32>
    %88 = vector.multi_reduction <maximumf>, %87, %cst_48 [1] : vector<8x8xf32> to vector<8xf32>
    %89 = vector.shape_cast %88 : vector<8xf32> to vector<8x1xf32>
    %90 = vector.broadcast %89 : vector<8x1xf32> to vector<8x8xf32>
    %91 = arith.subf %87, %90 : vector<8x8xf32>
    %92 = math.exp %91 : vector<8x8xf32>
    %cst_49 = arith.constant dense<0.000000e+00> : vector<8xf32>
    %93 = vector.multi_reduction <add>, %92, %cst_49 [1] : vector<8x8xf32> to vector<8xf32>
    %94 = vector.shape_cast %93 : vector<8xf32> to vector<8x1xf32>
    %95 = tpu.reciprocal %94 {approx = true} : vector<8x1xf32> -> vector<8x1xf32>
    %96 = vector.broadcast %95 : vector<8x1xf32> to vector<8x8xf32>
    %97 = arith.mulf %92, %96 : vector<8x8xf32>
    %98 = arith.addf %79, %97 : vector<8x8xf32>
    %cst_50 = arith.constant dense<0.000000e+00> : vector<8x8xf32>
    %99 = tpu.matmul %97, %86, %cst_50 {dimension_numbers = #tpu.dot_dimension_numbers<[1], [0], [0], [1], [0, 0, 1, 1], [], []>} : vector<8x8xf32>, vector<8x8xf32>, vector<8x8xf32> -> vector<8x8xf32>
    %100 = vector.extract_strided_slice %9 {offsets = [24, 0], sizes = [8, 32], strides = [1, 1]} : vector<32x32xf32> to vector<8x32xf32>
    %cst_51 = arith.constant dense<0.000000e+00> : vector<8x32xf32>
    %101 = tpu.matmul %99, %100, %cst_51 {dimension_numbers = #tpu.dot_dimension_numbers<[1], [0], [0], [1], [0, 0, 1, 1], [], []>} : vector<8x8xf32>, vector<8x32xf32>, vector<8x32xf32> -> vector<8x32xf32>
    %102 = arith.addf %83, %101 : vector<8x32xf32>
    %103 = vector.broadcast %13 : vector<1x32xf32> to vector<8x32xf32>
    %104 = arith.addf %102, %103 : vector<8x32xf32>
    %105 = arith.addf %104, %1 : vector<8x32xf32>
    %cst_52 = arith.constant dense<0.000000e+00> : vector<8xf32>
    %106 = vector.multi_reduction <add>, %105, %cst_52 [1] : vector<8x32xf32> to vector<8xf32>
    %107 = vector.shape_cast %106 : vector<8xf32> to vector<8x1xf32>
    %cst_53 = arith.constant 3.200000e+01 : f32
    %108 = vector.broadcast %cst_53 : f32 to vector<8x1xf32>
    %109 = arith.divf %107, %108 : vector<8x1xf32>
    %110 = vector.broadcast %109 : vector<8x1xf32> to vector<8x32xf32>
    %111 = arith.subf %105, %110 : vector<8x32xf32>
    %112 = arith.mulf %111, %111 : vector<8x32xf32>
    %cst_54 = arith.constant dense<0.000000e+00> : vector<8xf32>
    %113 = vector.multi_reduction <add>, %112, %cst_54 [1] : vector<8x32xf32> to vector<8xf32>
    %114 = vector.shape_cast %113 : vector<8xf32> to vector<8x1xf32>
    %cst_55 = arith.constant 3.200000e+01 : f32
    %115 = vector.broadcast %cst_55 : f32 to vector<8x1xf32>
    %116 = arith.divf %114, %115 : vector<8x1xf32>
    %117 = vector.broadcast %109 : vector<8x1xf32> to vector<8x32xf32>
    %118 = arith.subf %105, %117 : vector<8x32xf32>
    %cst_56 = arith.constant 9.99999974E-6 : f32
    %119 = vector.broadcast %cst_56 : f32 to vector<8x1xf32>
    %120 = arith.addf %116, %119 : vector<8x1xf32>
    %121 = math.rsqrt %120 : vector<8x1xf32>
    %122 = vector.broadcast %121 : vector<8x1xf32> to vector<8x32xf32>
    %123 = arith.mulf %118, %122 : vector<8x32xf32>
    %124 = vector.broadcast %14 : vector<1x32xf32> to vector<8x32xf32>
    %125 = arith.mulf %123, %124 : vector<8x32xf32>
    %126 = vector.broadcast %15 : vector<1x32xf32> to vector<8x32xf32>
    %127 = arith.addf %125, %126 : vector<8x32xf32>
    %cst_57 = arith.constant 2.500000e-01 : f32
    %128 = vector.broadcast %cst_57 : f32 to vector<8x8xf32>
    %129 = arith.mulf %98, %128 : vector<8x8xf32>
    %cst_58 = arith.constant dense<0.000000e+00> : vector<8x32xf32>
    %130 = tpu.matmul %3, %6, %cst_58 {dimension_numbers = #tpu.dot_dimension_numbers<[1], [0], [0], [1], [0, 0, 1, 1], [], []>} : vector<8x32xf32>, vector<32x32xf32>, vector<8x32xf32> -> vector<8x32xf32>
    %131 = vector.broadcast %10 : vector<1x32xf32> to vector<8x32xf32>
    %132 = arith.addf %130, %131 : vector<8x32xf32>
    %cst_59 = arith.constant dense<0.000000e+00> : vector<8x32xf32>
    %133 = tpu.matmul %1, %7, %cst_59 {dimension_numbers = #tpu.dot_dimension_numbers<[1], [0], [0], [1], [0, 0, 1, 1], [], []>} : vector<8x32xf32>, vector<32x32xf32>, vector<8x32xf32> -> vector<8x32xf32>
    %134 = vector.broadcast %11 : vector<1x32xf32> to vector<8x32xf32>
    %135 = arith.addf %133, %134 : vector<8x32xf32>
    %cst_60 = arith.constant dense<0.000000e+00> : vector<8x32xf32>
    %136 = tpu.matmul %1, %8, %cst_60 {dimension_numbers = #tpu.dot_dimension_numbers<[1], [0], [0], [1], [0, 0, 1, 1], [], []>} : vector<8x32xf32>, vector<32x32xf32>, vector<8x32xf32> -> vector<8x32xf32>
    %137 = vector.broadcast %12 : vector<1x32xf32> to vector<8x32xf32>
    %138 = arith.addf %136, %137 : vector<8x32xf32>
    %cst_61 = arith.constant 0.000000e+00 : f32
    %139 = vector.broadcast %cst_61 : f32 to vector<8x32xf32>
    %cst_62 = arith.constant 0.000000e+00 : f32
    %140 = vector.broadcast %cst_62 : f32 to vector<8x8xf32>
    %141 = vector.extract_strided_slice %132 {offsets = [0, 0], sizes = [8, 8], strides = [1, 1]} : vector<8x32xf32> to vector<8x8xf32>
    %142 = vector.extract_strided_slice %135 {offsets = [0, 0], sizes = [8, 8], strides = [1, 1]} : vector<8x32xf32> to vector<8x8xf32>
    %143 = vector.extract_strided_slice %138 {offsets = [0, 0], sizes = [8, 8], strides = [1, 1]} : vector<8x32xf32> to vector<8x8xf32>
    "tpu.trace_start"() <{level = 10 : i32, message = "ld,sd->ls"}> : () -> ()
    %cst_63 = arith.constant dense<0.000000e+00> : vector<8x8xf32>
    %144 = tpu.matmul %141, %142, %cst_63 {dimension_numbers = #tpu.dot_dimension_numbers<[1], [1], [0], [0], [0, 0, 1, 0], [], []>} : vector<8x8xf32>, vector<8x8xf32>, vector<8x8xf32> -> vector<8x8xf32>
    "tpu.trace_stop"() : () -> ()
    %cst_64 = arith.constant dense<0xFF800000> : vector<8xf32>
    %145 = vector.multi_reduction <maximumf>, %144, %cst_64 [1] : vector<8x8xf32> to vector<8xf32>
    %146 = vector.shape_cast %145 : vector<8xf32> to vector<8x1xf32>
    %147 = vector.broadcast %146 : vector<8x1xf32> to vector<8x8xf32>
    %148 = arith.subf %144, %147 : vector<8x8xf32>
    %149 = math.exp %148 : vector<8x8xf32>
    %cst_65 = arith.constant dense<0.000000e+00> : vector<8xf32>
    %150 = vector.multi_reduction <add>, %149, %cst_65 [1] : vector<8x8xf32> to vector<8xf32>
    %151 = vector.shape_cast %150 : vector<8xf32> to vector<8x1xf32>
    %152 = tpu.reciprocal %151 {approx = true} : vector<8x1xf32> -> vector<8x1xf32>
    %153 = vector.broadcast %152 : vector<8x1xf32> to vector<8x8xf32>
    %154 = arith.mulf %149, %153 : vector<8x8xf32>
    %155 = arith.addf %140, %154 : vector<8x8xf32>
    %cst_66 = arith.constant dense<0.000000e+00> : vector<8x8xf32>
    %156 = tpu.matmul %154, %143, %cst_66 {dimension_numbers = #tpu.dot_dimension_numbers<[1], [0], [0], [1], [0, 0, 1, 1], [], []>} : vector<8x8xf32>, vector<8x8xf32>, vector<8x8xf32> -> vector<8x8xf32>
    %157 = vector.extract_strided_slice %9 {offsets = [0, 0], sizes = [8, 32], strides = [1, 1]} : vector<32x32xf32> to vector<8x32xf32>
    %cst_67 = arith.constant dense<0.000000e+00> : vector<8x32xf32>
    %158 = tpu.matmul %156, %157, %cst_67 {dimension_numbers = #tpu.dot_dimension_numbers<[1], [0], [0], [1], [0, 0, 1, 1], [], []>} : vector<8x8xf32>, vector<8x32xf32>, vector<8x32xf32> -> vector<8x32xf32>
    %159 = arith.addf %139, %158 : vector<8x32xf32>
    %160 = vector.extract_strided_slice %132 {offsets = [0, 8], sizes = [8, 8], strides = [1, 1]} : vector<8x32xf32> to vector<8x8xf32>
    %161 = vector.extract_strided_slice %135 {offsets = [0, 8], sizes = [8, 8], strides = [1, 1]} : vector<8x32xf32> to vector<8x8xf32>
    %162 = vector.extract_strided_slice %138 {offsets = [0, 8], sizes = [8, 8], strides = [1, 1]} : vector<8x32xf32> to vector<8x8xf32>
    "tpu.trace_start"() <{level = 10 : i32, message = "ld,sd->ls"}> : () -> ()
    %cst_68 = arith.constant dense<0.000000e+00> : vector<8x8xf32>
    %163 = tpu.matmul %160, %161, %cst_68 {dimension_numbers = #tpu.dot_dimension_numbers<[1], [1], [0], [0], [0, 0, 1, 0], [], []>} : vector<8x8xf32>, vector<8x8xf32>, vector<8x8xf32> -> vector<8x8xf32>
    "tpu.trace_stop"() : () -> ()
    %cst_69 = arith.constant dense<0xFF800000> : vector<8xf32>
    %164 = vector.multi_reduction <maximumf>, %163, %cst_69 [1] : vector<8x8xf32> to vector<8xf32>
    %165 = vector.shape_cast %164 : vector<8xf32> to vector<8x1xf32>
    %166 = vector.broadcast %165 : vector<8x1xf32> to vector<8x8xf32>
    %167 = arith.subf %163, %166 : vector<8x8xf32>
    %168 = math.exp %167 : vector<8x8xf32>
    %cst_70 = arith.constant dense<0.000000e+00> : vector<8xf32>
    %169 = vector.multi_reduction <add>, %168, %cst_70 [1] : vector<8x8xf32> to vector<8xf32>
    %170 = vector.shape_cast %169 : vector<8xf32> to vector<8x1xf32>
    %171 = tpu.reciprocal %170 {approx = true} : vector<8x1xf32> -> vector<8x1xf32>
    %172 = vector.broadcast %171 : vector<8x1xf32> to vector<8x8xf32>
    %173 = arith.mulf %168, %172 : vector<8x8xf32>
    %174 = arith.addf %155, %173 : vector<8x8xf32>
    %cst_71 = arith.constant dense<0.000000e+00> : vector<8x8xf32>
    %175 = tpu.matmul %173, %162, %cst_71 {dimension_numbers = #tpu.dot_dimension_numbers<[1], [0], [0], [1], [0, 0, 1, 1], [], []>} : vector<8x8xf32>, vector<8x8xf32>, vector<8x8xf32> -> vector<8x8xf32>
    %176 = vector.extract_strided_slice %9 {offsets = [8, 0], sizes = [8, 32], strides = [1, 1]} : vector<32x32xf32> to vector<8x32xf32>
    %cst_72 = arith.constant dense<0.000000e+00> : vector<8x32xf32>
    %177 = tpu.matmul %175, %176, %cst_72 {dimension_numbers = #tpu.dot_dimension_numbers<[1], [0], [0], [1], [0, 0, 1, 1], [], []>} : vector<8x8xf32>, vector<8x32xf32>, vector<8x32xf32> -> vector<8x32xf32>
    %178 = arith.addf %159, %177 : vector<8x32xf32>
    %179 = vector.extract_strided_slice %132 {offsets = [0, 16], sizes = [8, 8], strides = [1, 1]} : vector<8x32xf32> to vector<8x8xf32>
    %180 = vector.extract_strided_slice %135 {offsets = [0, 16], sizes = [8, 8], strides = [1, 1]} : vector<8x32xf32> to vector<8x8xf32>
    %181 = vector.extract_strided_slice %138 {offsets = [0, 16], sizes = [8, 8], strides = [1, 1]} : vector<8x32xf32> to vector<8x8xf32>
    "tpu.trace_start"() <{level = 10 : i32, message = "ld,sd->ls"}> : () -> ()
    %cst_73 = arith.constant dense<0.000000e+00> : vector<8x8xf32>
    %182 = tpu.matmul %179, %180, %cst_73 {dimension_numbers = #tpu.dot_dimension_numbers<[1], [1], [0], [0], [0, 0, 1, 0], [], []>} : vector<8x8xf32>, vector<8x8xf32>, vector<8x8xf32> -> vector<8x8xf32>
    "tpu.trace_stop"() : () -> ()
    %cst_74 = arith.constant dense<0xFF800000> : vector<8xf32>
    %183 = vector.multi_reduction <maximumf>, %182, %cst_74 [1] : vector<8x8xf32> to vector<8xf32>
    %184 = vector.shape_cast %183 : vector<8xf32> to vector<8x1xf32>
    %185 = vector.broadcast %184 : vector<8x1xf32> to vector<8x8xf32>
    %186 = arith.subf %182, %185 : vector<8x8xf32>
    %187 = math.exp %186 : vector<8x8xf32>
    %cst_75 = arith.constant dense<0.000000e+00> : vector<8xf32>
    %188 = vector.multi_reduction <add>, %187, %cst_75 [1] : vector<8x8xf32> to vector<8xf32>
    %189 = vector.shape_cast %188 : vector<8xf32> to vector<8x1xf32>
    %190 = tpu.reciprocal %189 {approx = true} : vector<8x1xf32> -> vector<8x1xf32>
    %191 = vector.broadcast %190 : vector<8x1xf32> to vector<8x8xf32>
    %192 = arith.mulf %187, %191 : vector<8x8xf32>
    %193 = arith.addf %174, %192 : vector<8x8xf32>
    %cst_76 = arith.constant dense<0.000000e+00> : vector<8x8xf32>
    %194 = tpu.matmul %192, %181, %cst_76 {dimension_numbers = #tpu.dot_dimension_numbers<[1], [0], [0], [1], [0, 0, 1, 1], [], []>} : vector<8x8xf32>, vector<8x8xf32>, vector<8x8xf32> -> vector<8x8xf32>
    %195 = vector.extract_strided_slice %9 {offsets = [16, 0], sizes = [8, 32], strides = [1, 1]} : vector<32x32xf32> to vector<8x32xf32>
    %cst_77 = arith.constant dense<0.000000e+00> : vector<8x32xf32>
    %196 = tpu.matmul %194, %195, %cst_77 {dimension_numbers = #tpu.dot_dimension_numbers<[1], [0], [0], [1], [0, 0, 1, 1], [], []>} : vector<8x8xf32>, vector<8x32xf32>, vector<8x32xf32> -> vector<8x32xf32>
    %197 = arith.addf %178, %196 : vector<8x32xf32>
    %198 = vector.extract_strided_slice %132 {offsets = [0, 24], sizes = [8, 8], strides = [1, 1]} : vector<8x32xf32> to vector<8x8xf32>
    %199 = vector.extract_strided_slice %135 {offsets = [0, 24], sizes = [8, 8], strides = [1, 1]} : vector<8x32xf32> to vector<8x8xf32>
    %200 = vector.extract_strided_slice %138 {offsets = [0, 24], sizes = [8, 8], strides = [1, 1]} : vector<8x32xf32> to vector<8x8xf32>
    "tpu.trace_start"() <{level = 10 : i32, message = "ld,sd->ls"}> : () -> ()
    %cst_78 = arith.constant dense<0.000000e+00> : vector<8x8xf32>
    %201 = tpu.matmul %198, %199, %cst_78 {dimension_numbers = #tpu.dot_dimension_numbers<[1], [1], [0], [0], [0, 0, 1, 0], [], []>} : vector<8x8xf32>, vector<8x8xf32>, vector<8x8xf32> -> vector<8x8xf32>
    "tpu.trace_stop"() : () -> ()
    %cst_79 = arith.constant dense<0xFF800000> : vector<8xf32>
    %202 = vector.multi_reduction <maximumf>, %201, %cst_79 [1] : vector<8x8xf32> to vector<8xf32>
    %203 = vector.shape_cast %202 : vector<8xf32> to vector<8x1xf32>
    %204 = vector.broadcast %203 : vector<8x1xf32> to vector<8x8xf32>
    %205 = arith.subf %201, %204 : vector<8x8xf32>
    %206 = math.exp %205 : vector<8x8xf32>
    %cst_80 = arith.constant dense<0.000000e+00> : vector<8xf32>
    %207 = vector.multi_reduction <add>, %206, %cst_80 [1] : vector<8x8xf32> to vector<8xf32>
    %208 = vector.shape_cast %207 : vector<8xf32> to vector<8x1xf32>
    %209 = tpu.reciprocal %208 {approx = true} : vector<8x1xf32> -> vector<8x1xf32>
    %210 = vector.broadcast %209 : vector<8x1xf32> to vector<8x8xf32>
    %211 = arith.mulf %206, %210 : vector<8x8xf32>
    %212 = arith.addf %193, %211 : vector<8x8xf32>
    %cst_81 = arith.constant dense<0.000000e+00> : vector<8x8xf32>
    %213 = tpu.matmul %211, %200, %cst_81 {dimension_numbers = #tpu.dot_dimension_numbers<[1], [0], [0], [1], [0, 0, 1, 1], [], []>} : vector<8x8xf32>, vector<8x8xf32>, vector<8x8xf32> -> vector<8x8xf32>
    %214 = vector.extract_strided_slice %9 {offsets = [24, 0], sizes = [8, 32], strides = [1, 1]} : vector<32x32xf32> to vector<8x32xf32>
    %cst_82 = arith.constant dense<0.000000e+00> : vector<8x32xf32>
    %215 = tpu.matmul %213, %214, %cst_82 {dimension_numbers = #tpu.dot_dimension_numbers<[1], [0], [0], [1], [0, 0, 1, 1], [], []>} : vector<8x8xf32>, vector<8x32xf32>, vector<8x32xf32> -> vector<8x32xf32>
    %216 = arith.addf %197, %215 : vector<8x32xf32>
    %217 = vector.broadcast %13 : vector<1x32xf32> to vector<8x32xf32>
    %218 = arith.addf %216, %217 : vector<8x32xf32>
    %219 = arith.addf %218, %3 : vector<8x32xf32>
    %cst_83 = arith.constant dense<0.000000e+00> : vector<8xf32>
    %220 = vector.multi_reduction <add>, %219, %cst_83 [1] : vector<8x32xf32> to vector<8xf32>
    %221 = vector.shape_cast %220 : vector<8xf32> to vector<8x1xf32>
    %cst_84 = arith.constant 3.200000e+01 : f32
    %222 = vector.broadcast %cst_84 : f32 to vector<8x1xf32>
    %223 = arith.divf %221, %222 : vector<8x1xf32>
    %224 = vector.broadcast %223 : vector<8x1xf32> to vector<8x32xf32>
    %225 = arith.subf %219, %224 : vector<8x32xf32>
    %226 = arith.mulf %225, %225 : vector<8x32xf32>
    %cst_85 = arith.constant dense<0.000000e+00> : vector<8xf32>
    %227 = vector.multi_reduction <add>, %226, %cst_85 [1] : vector<8x32xf32> to vector<8xf32>
    %228 = vector.shape_cast %227 : vector<8xf32> to vector<8x1xf32>
    %cst_86 = arith.constant 3.200000e+01 : f32
    %229 = vector.broadcast %cst_86 : f32 to vector<8x1xf32>
    %230 = arith.divf %228, %229 : vector<8x1xf32>
    %231 = vector.broadcast %223 : vector<8x1xf32> to vector<8x32xf32>
    %232 = arith.subf %219, %231 : vector<8x32xf32>
    %cst_87 = arith.constant 9.99999974E-6 : f32
    %233 = vector.broadcast %cst_87 : f32 to vector<8x1xf32>
    %234 = arith.addf %230, %233 : vector<8x1xf32>
    %235 = math.rsqrt %234 : vector<8x1xf32>
    %236 = vector.broadcast %235 : vector<8x1xf32> to vector<8x32xf32>
    %237 = arith.mulf %232, %236 : vector<8x32xf32>
    %238 = vector.broadcast %14 : vector<1x32xf32> to vector<8x32xf32>
    %239 = arith.mulf %237, %238 : vector<8x32xf32>
    %240 = vector.broadcast %15 : vector<1x32xf32> to vector<8x32xf32>
    %241 = arith.addf %239, %240 : vector<8x32xf32>
    %cst_88 = arith.constant 2.500000e-01 : f32
    %242 = vector.broadcast %cst_88 : f32 to vector<8x8xf32>
    %243 = arith.mulf %212, %242 : vector<8x8xf32>
    %c0_89 = arith.constant 0 : index
    %244 = memref.load %arg14[%c0_89] : memref<1xf32, #tpu.memory_space<smem>>
    %245 = vector.broadcast %244 : f32 to vector<8x32xf32>
    %246 = arith.mulf %245, %127 : vector<8x32xf32>
    %cst_90 = arith.constant 1.000000e+00 : f32
    %247 = arith.subf %cst_90, %244 : f32
    %248 = vector.broadcast %247 : f32 to vector<8x32xf32>
    %249 = arith.mulf %248, %241 : vector<8x32xf32>
    %250 = arith.addf %246, %249 : vector<8x32xf32>
    %c0_91 = arith.constant 0 : index
    %c0_92 = arith.constant 0 : index
    %c0_93 = arith.constant 0 : index
    %251 = vector.load %arg15[%c0_91, %c0_92, %c0_93] : memref<1x8x32xf32, #tpu.memory_space<vmem>>, vector<1x8x32xf32>
    %252 = vector.shape_cast %251 : vector<1x8x32xf32> to vector<8x32xf32>
    %253 = vector.shape_cast %250 : vector<8x32xf32> to vector<1x8x32xf32>
    tpu.vector_store %arg15[%c0_91, %c0_92, %c0_93], %253 {strides = array<i32>} : memref<1x8x32xf32, #tpu.memory_space<vmem>>, vector<1x8x32xf32>,
    %c0_94 = arith.constant 0 : index
    %c0_95 = arith.constant 0 : index
    %c0_96 = arith.constant 0 : index
    %254 = vector.load %arg16[%c0_94, %c0_95, %c0_96] : memref<1x8x8xf32, #tpu.memory_space<vmem>>, vector<1x8x8xf32>
    %255 = vector.shape_cast %254 : vector<1x8x8xf32> to vector<8x8xf32>
    %256 = vector.shape_cast %129 : vector<8x8xf32> to vector<1x8x8xf32>
    tpu.vector_store %arg16[%c0_94, %c0_95, %c0_96], %256 {strides = array<i32>} : memref<1x8x8xf32, #tpu.memory_space<vmem>>, vector<1x8x8xf32>,
    %c0_97 = arith.constant 0 : index
    %c0_98 = arith.constant 0 : index
    %c0_99 = arith.constant 0 : index
    %257 = vector.load %arg17[%c0_97, %c0_98, %c0_99] : memref<1x8x8xf32, #tpu.memory_space<vmem>>, vector<1x8x8xf32>
    %258 = vector.shape_cast %257 : vector<1x8x8xf32> to vector<8x8xf32>
    %259 = vector.shape_cast %243 : vector<8x8xf32> to vector<1x8x8xf32>
    tpu.vector_store %arg17[%c0_97, %c0_98, %c0_99], %259 {strides = array<i32>} : memref<1x8x8xf32, #tpu.memory_space<vmem>>, vector<1x8x8xf32>,
    return
  }
  func.func @transform_0(%arg0: i32) -> (i32, i32, i32) {
    %c0_i32 = arith.constant 0 : i32
    %c0_i32_0 = arith.constant 0 : i32
    %c0_i32_1 = arith.constant 0 : i32
    return %arg0, %c0_i32, %c0_i32_0 : i32, i32, i32
  }
  func.func @transform_1(%arg0: i32) -> (i32, i32, i32) {
    %c0_i32 = arith.constant 0 : i32
    %c0_i32_0 = arith.constant 0 : i32
    %c0_i32_1 = arith.constant 0 : i32
    return %arg0, %c0_i32, %c0_i32_0 : i32, i32, i32
  }
  func.func @transform_2(%arg0: i32) -> (i32, i32, i32) {
    %c0_i32 = arith.constant 0 : i32
    %c0_i32_0 = arith.constant 0 : i32
    %c0_i32_1 = arith.constant 0 : i32
    return %arg0, %c0_i32, %c0_i32_0 : i32, i32, i32
  }
  func.func @transform_3(%arg0: i32) -> (i32, i32) {
    %c0_i32 = arith.constant 0 : i32
    %c0_i32_0 = arith.constant 0 : i32
    %c0_i32_1 = arith.constant 0 : i32
    return %c0_i32, %c0_i32_0 : i32, i32
  }
  func.func @transform_4(%arg0: i32) -> (i32, i32) {
    %c0_i32 = arith.constant 0 : i32
    %c0_i32_0 = arith.constant 0 : i32
    %c0_i32_1 = arith.constant 0 : i32
    return %c0_i32, %c0_i32_0 : i32, i32
  }
  func.func @transform_5(%arg0: i32) -> (i32, i32) {
    %c0_i32 = arith.constant 0 : i32
    %c0_i32_0 = arith.constant 0 : i32
    %c0_i32_1 = arith.constant 0 : i32
    return %c0_i32, %c0_i32_0 : i32, i32
  }
  func.func @transform_6(%arg0: i32) -> (i32, i32) {
    %c0_i32 = arith.constant 0 : i32
    %c0_i32_0 = arith.constant 0 : i32
    %c0_i32_1 = arith.constant 0 : i32
    return %c0_i32, %c0_i32_0 : i32, i32
  }
  func.func @transform_7(%arg0: i32) -> (i32, i32) {
    %c0_i32 = arith.constant 0 : i32
    %c0_i32_0 = arith.constant 0 : i32
    %c0_i32_1 = arith.constant 0 : i32
    return %c0_i32, %c0_i32_0 : i32, i32
  }
  func.func @transform_8(%arg0: i32) -> (i32, i32) {
    %c0_i32 = arith.constant 0 : i32
    %c0_i32_0 = arith.constant 0 : i32
    %c0_i32_1 = arith.constant 0 : i32
    return %c0_i32, %c0_i32_0 : i32, i32
  }
  func.func @transform_9(%arg0: i32) -> (i32, i32) {
    %c0_i32 = arith.constant 0 : i32
    %c0_i32_0 = arith.constant 0 : i32
    %c0_i32_1 = arith.constant 0 : i32
    return %c0_i32, %c0_i32_0 : i32, i32
  }
  func.func @transform_10(%arg0: i32) -> (i32, i32) {
    %c0_i32 = arith.constant 0 : i32
    %c0_i32_0 = arith.constant 0 : i32
    %c0_i32_1 = arith.constant 0 : i32
    return %c0_i32, %c0_i32_0 : i32, i32
  }
  func.func @transform_11(%arg0: i32) -> (i32, i32) {
    %c0_i32 = arith.constant 0 : i32
    %c0_i32_0 = arith.constant 0 : i32
    %c0_i32_1 = arith.constant 0 : i32
    return %c0_i32, %c0_i32_0 : i32, i32
  }
  func.func @transform_12(%arg0: i32) -> (i32, i32) {
    %c0_i32 = arith.constant 0 : i32
    %c0_i32_0 = arith.constant 0 : i32
    %c0_i32_1 = arith.constant 0 : i32
    return %c0_i32, %c0_i32_0 : i32, i32
  }
  func.func @transform_13(%arg0: i32) -> i32 {
    %c0_i32 = arith.constant 0 : i32
    %c0_i32_0 = arith.constant 0 : i32
    return %c0_i32 : i32
  }
  func.func @transform_14(%arg0: i32) -> (i32, i32, i32) {
    %c0_i32 = arith.constant 0 : i32
    %c0_i32_0 = arith.constant 0 : i32
    %c0_i32_1 = arith.constant 0 : i32
    return %arg0, %c0_i32, %c0_i32_0 : i32, i32, i32
  }
  func.func @transform_15(%arg0: i32) -> (i32, i32, i32) {
    %c0_i32 = arith.constant 0 : i32
    %c0_i32_0 = arith.constant 0 : i32
    %c0_i32_1 = arith.constant 0 : i32
    return %arg0, %c0_i32, %c0_i32_0 : i32, i32, i32
  }
  func.func @transform_16(%arg0: i32) -> (i32, i32, i32) {
    %c0_i32 = arith.constant 0 : i32
    %c0_i32_0 = arith.constant 0 : i32
    %c0_i32_1 = arith.constant 0 : i32
    return %arg0, %c0_i32, %c0_i32_0 : i32, i32, i32
  }
}

</mosaic_0001>

<bundles_post_ra>
// kernel: cross_attention_forward.1
= control target key start
LH: loop header
LB: loop body
LE: loop exit
PB: predicated region body
PF: predicated region fallthrough
CT: control target
= control target key end

     0   :  { %s2418_s0 = inlined_call_operand.vmem [shape: f32[2,8,32], index: 0, kind: input, shape index: {}]   ;;  %s2419_s1 = inlined_call_operand.vmem [shape: f32[2,8,32], index: 1, kind: input, shape index: {}]   ;;  %s2420_s2 = inlined_call_operand.vmem [shape: f32[2,8,32], index: 2, kind: input, shape index: {}]   ;;  %s2421_s3 = inlined_call_operand.vmem [shape: f32[32,32], index: 3, kind: input, shape index: {}]   ;;  %s2422_s4 = inlined_call_operand.vmem [shape: f32[32,32], index: 4, kind: input, shape index: {}]   ;;  %s2423_s5 = inlined_call_operand.vmem [shape: f32[32,32], index: 5, kind: input, shape index: {}]   ;;  %s2424_s6 = inlined_call_operand.vmem [shape: f32[32,32], index: 6, kind: input, shape index: {}]   ;;  %s2425_s7 = inlined_call_operand.vmem [shape: f32[1,32], index: 7, kind: input, shape index: {}]   ;;  %s2426_s8 = inlined_call_operand.vmem [shape: f32[1,32], index: 8, kind: input, shape index: {}]   ;;  %s2427_s9 = inlined_call_operand.vmem [shape: f32[1,32], index: 9, kind: input, shape index: {}]   ;;  %s2428_s10 = inlined_call_operand.vmem [shape: f32[1,32], index: 10, kind: input, shape index: {}]   ;;  %s2429_s11 = inlined_call_operand.vmem [shape: f32[1,32], index: 11, kind: input, shape index: {}]   ;;  %s2430_s12 = inlined_call_operand.vmem [shape: f32[1,32], index: 12, kind: input, shape index: {}]   ;;  %s2431_s13 = inlined_call_operand.<no memory space> [shape: f32[1], index: 13, kind: input, shape index: {}]   ;;  %s2432_s14 = inlined_call_operand.vmem [shape: f32[2,8,32], index: 14, kind: output, shape index: {0}]   ;;  %s2433_s15 = inlined_call_operand.hbm [shape: f32[2,8,8], index: 15, kind: output, shape index: {1}]   ;;  %s2434_s16 = inlined_call_operand.hbm [shape: f32[2,8,8], index: 16, kind: output, shape index: {2}]  }
   0x1   :  { %2442 = sst [smem:[#allocation11_spill]] %s2418_s0 }
   0x2   :  { %2443 = sst [smem:[#allocation12_spill]] %s2419_s1 }
   0x3   :  { %2444 = sst [smem:[#allocation13_spill]] %s2420_s2 }
   0x4   :  { %2445 = sst [smem:[#allocation14_spill]] %s2421_s3 }
   0x5   :  { %2446 = sst [smem:[#allocation15_spill]] %s2422_s4 }
   0x6   :  { %2447 = sst [smem:[#allocation16_spill]] %s2423_s5 }
   0x7   :  { %2448 = sst [smem:[#allocation17_spill]] %s2424_s6 }
   0x8   :  { %2449 = sst [smem:[#allocation18_spill]] %s2425_s7 }
   0x9   :  { %2450 = sst [smem:[#allocation19_spill]] %s2426_s8 }
   0xa   :  { %2451 = sst [smem:[#allocation20_spill]] %s2427_s9 }
   0xb   :  { %22 = sst [smem:[#allocation2]] %s2431_s13 }
   0xc   :  { %23 = vsyncpa [#allocation4], 0 }
   0xd   :  { %25 = vsyncpa [#allocation4 + $0x1], 0 }
   0xe   :  { %26 = vsyncpa [#allocation6], 0 }
   0xf   :  { %28 = vsyncpa [#allocation6 + $0x1], 0  ;;  %s2042_s23 = smov 0   ;;  %s2044_s24 = smov 0  }
  0x10   :  { %s2046_s25 = smov 0   ;;  %s2048_s26 = smov 0  }
  0x11 LB: > { %2452 = sst [smem:[#allocation9_spill]] %s1944_s25  ;;  %s2063_s13 = sadd.s32 4294967295, %s1948_s26   ;;  %s1948_s26 = sphi %s2048_s26, %s2473_s26   ;;  %s1944_s25 = sphi %s2046_s25, %s2470_s25   ;;  %s1940_s24 = sphi %s2044_s24, %s2472_s24   ;;  %s1936_s23 = sphi %s2042_s23, %s2471_s23  }
  0x12   : > { %s1708_s27 = sadd.s32 4294967294, %s1948_s26   ;;  %s2067_s28 = sadd.s32 1, %s1948_s26  }
  0x13   : > { %s376_s29 = sadd.s32 1, %s1944_s25  ;;  %s373_s30 = ssub.s32 %s1948_s26, %s2067_s28 }
  0x14   : > { %p386_p0 = scmp.ne.s32.totalorder %s1944_s25, %s1940_s24  ;;  %p374_p1 = scmp.eq.s32.totalorder %s373_s30, 0 }
  0x15   : > { %p387_p2 = scmp.eq.s32.totalorder %s2063_s13, 1  ;;  %p392_p3 = scmp.ne.s32.totalorder %s1940_s24, %s1936_s23 }
  0x16   : > { %p393_p4 = scmp.eq.s32.totalorder %s1708_s27, 1  ;;  %p1711_p7 = scmp.ge.s32.totalorder %s1948_s26, 1 }
  0x17   : > { %s2078_s0 = scalar_select %p374_p1, %s1944_s25, %s376_s29  }
  0x18   : > { %p2080_p5 = por %p387_p2, %p386_p0  ;;  %p2084_p6 = por %p393_p4, %p392_p3 }
  0x19   : > { %2453 = sst [smem:[#allocation10_spill]] %s2078_s0  ;;  %p491_p8 = scmp.lt.s32.totalorder %s1948_s26, 3 }
  0x1b   : > { %p492_p9 = pnand %p1711_p7, %p491_p8 }
  0x1c   : > { %s2456_s4 = sld [smem:[#allocation15_spill]] (!%p492_p9)  ;;  %p557_p10 = scmp.lt.s32.totalorder (!%p492_p9), %s2063_s13, 1 }
  0x1d   : > { %495 = sbr.rel (%p492_p9) target bundleno = 2683 (0xa7b), region = 76  ;;  %s2457_s3 = sld [smem:[#allocation14_spill]] (!%p492_p9) }
  0x1e   : > { %s2458_s1 = sld [smem:[#allocation12_spill]] (!%p492_p9)  ;;  %s2440_s25 = smov (!%p492_p9), 104  }
  0x1f   : > { %s2459_s29 = sld [smem:[#allocation11_spill]] (!%p492_p9)  ;;  %s2466_s0 = smov (!%p492_p9), 112  }
  0x20   : > { %s2460_s8 = sld [smem:[#allocation19_spill]] (!%p492_p9)  ;;  %s2468_s21 = smov (!%p492_p9), 120  }
  0x21   : > { %s2461_s7 = sld [smem:[#allocation18_spill]] (!%p492_p9)  ;;  %s2271_s19 = sand.u32 (!%p492_p9), 1, %s1940_s24  }
  0x22   : > { %v2093_v0 = vld [vmem:[%s2456_s4 + $0x18] sm:$0xff]  ;;  %v2098_v1 = vld [vmem:[%s2456_s4 + $0x10] sm:$0xff]  ;;  %v2116_v4 = vld [vmem:[%s2456_s4 + $0x8] sm:$0xff]  ;;  %s558_s27 = scalar_select %p557_p10, %s2063_s13, 1  ;;  %vm601_vm0 = vcmask 261120   ;;  %vm677_vm1 = vcmask 64512  }
  0x23   : > { %v2103_v2 = vld [vmem:[%s2457_s3 + $0x18] sm:$0xff]  ;;  %643 = vmatpush.msra.mxu1 %v2093_v0  ;;  %v2111_v3 = vld [vmem:[%s2457_s3 + $0x10] sm:$0xff]  ;;  %v2121_v5 = vld [vmem:[%s2457_s3 + $0x8] sm:$0xff]  ;;  %s2462_s5 = sld [smem:[#allocation16_spill]]  ;;  %s1712_s20 = sshll.u32 %s2271_s19, 3 }
  0x24   : > { %617 = vmatpush.msra.mxu0 %v2103_v2  ;;  %v2129_v6 = vld [vmem:[%s2456_s4] sm:$0xff]  ;;  %s2131_s30 = sshll.u32 %s558_s27, 3  ;;  %s2463_s2 = sld [smem:[#allocation13_spill]] }
  0x25   : > { %644 = vmatpush.msra.mxu1 %v2098_v1  ;;  %v2136_v7 = vld [vmem:[%s2457_s3] sm:$0xff]  ;;  %s564_s22 = scalar_lea.vmem %s2458_s1, %s2131_s30  ;;  %s560_s4 = scalar_lea.vmem %s2459_s29, %s2131_s30 }
  0x26   : > { %618 = vmatpush.msra.mxu0 %v2111_v3  ;;  %v2144_v8 = vld [vmem:[%s564_s22] sm:$0xff]  ;;  %s2436_s22 = smov 120   ;;  %s2465_s9 = sld [smem:[#allocation20_spill]] }
  0x27   : > { %645 = vmatpush.msra.mxu1 %v2116_v4  ;;  %v2152_v9 = vld [vmem:[%s560_s4] sm:$0xff]  ;;  %s2438_s4 = smov 112   ;;  %s2467_s6 = sld [smem:[#allocation17_spill]] }
  0x28   : > { %619 = vmatpush.msra.mxu0 %v2121_v5  ;;  %v2161_v10 = vld [vmem:[%s2460_s8] ss:$0 sm:$0xff]  ;;  %s2277_s27 = scalar_lea.vmem [#allocation3], %s1712_s20 }
  0x29   : > { %646 = vmatpush.msra.mxu1 %v2129_v6  ;;  %v2166_v11 = vld [vmem:[%s2461_s7] ss:$0 sm:$0xff]  ;;  %v2180_v16 = vld [vmem:[%s2462_s5 + $0x18] sm:$0xff]  ;;  %v2191_v23 = vld [vmem:[%s2462_s5 + $0x10] sm:$0xff] }
  0x2a   : > { %620 = vmatpush.msra.mxu0 %v2136_v7  ;;  %1719 = vmatmul.msk.f32.vlgmr.msra.gmra.mxu1 %vm601_vm0, %v2144_v8  ;;  %v2197_v24 = vld [vmem:[%s2462_s5 + $0x8] sm:$0xff]  ;;  %v2207_v25 = vld [vmem:[%s2462_s5] sm:$0xff]  ;;  %s1531_s5 = scalar_lea.sflag [#allocation4], %s2271_s19 }
  0x2b   : > { %1718 = vmatmul.msk.f32.vlgmr.msra.gmra.mxu0 %vm601_vm0, %v2152_v9  ;;  %669 = vmatpush.msra.mxu2 %v2180_v16 }
  0x2c   : > { %v2218_v36 = vld [vmem:[%s2465_s9] ss:$0 sm:$0xff] }
  0x2d   : > { %670 = vmatpush.msra.mxu2 %v2191_v23  ;;  %v2225_v39 = vld [vmem:[%s2467_s6] sm:$0xff] }
  0x2f   : > { %671 = vmatpush.msra.mxu2 %v2197_v24 }
  0x31   : > { %672 = vmatpush.msra.mxu2 %v2207_v25 }
  0xa7   : > { %v648_v12 = vpop.f32.mrf.mxu1 }
  0xa8   : > { %v622_v13 = vpop.f32.mrf.mxu0  ;;  %v649_v14 = vadd.f32 %v2161_v10, %v648_v12 }
  0xa9   : > { %v623_v15 = vadd.f32 %v2166_v11, %v622_v13 }
  0xaa   : > { %854 = vrot.lane.b32.xlu2 %v649_v14, %s2438_s4  ;;  %741 = vrot.lane.b32.xlu1 %v649_v14, %s2436_s22 }
  0xab   : > { %1721 = vmatpush.xpose.msk.msra.mxu3 %vm677_vm1, %v649_v14 }
  0xae   : > { %1722 = vmatmul.msk.f32.vlgmr.msra.gmra.mxu3 %vm677_vm1, %v623_v15 }
  0xb2   : > { %852 = vrot.lane.b32.xlu2 %v623_v15, %s2438_s4  ;;  %739 = vrot.lane.b32.xlu1 %v623_v15, %s2436_s22  ;;  %s568_s22 = scalar_lea.vmem %s2463_s2, %s2131_s30  ;;  %s2464_s4 = smov 104  }
  0xb3   : > { %v575_v26 = vld [vmem:[%s568_s22] sm:$0xff]  ;;  %s1551_s2 = sshll.u32 %s2277_s27, 4  ;;  %s1552_s2 = int_to_ptr.vmem [resolvable:$true] %s1551_s2 }
  0xb4   : > { %1720 = vmatmul.msk.f32.vlgmr.msra.gmra.mxu2 %vm601_vm0, %v575_v26 }
  0xba   : > { %942 = vrot.lane.b32.xlu1 %v623_v15, %s2440_s25  ;;  %v589_v15 = vld [vmem:[%s2467_s6 + $0x8] sm:$0xff] }
  0xbb   : > { %824 = vmatpush.msrb.mxu2 %v589_v15 }
 0x104   : > { %v855_v18 = vpop.permute.xlu2 %854 }
 0x10c   : > { %v853_v20 = vpop.permute.xlu2 %852 }
 0x11c   : > { %v742_v17 = vpop.permute.xlu1 %741 }
 0x11d   : > { %1724 = vmatpush.xpose.msk.msrb.mxu0 %vm677_vm1, %v742_v17 }
 0x121   : > { %1729 = vmatpush.xpose.msk.msra.mxu0 %vm677_vm1, %v855_v18 }
 0x124   : > { %v740_v19 = vpop.permute.xlu1 %739 }
 0x125   : > { %1725 = vmatmul.msk.f32.vlgmr.msrb.gmra.mxu0 %vm677_vm1, %v740_v19 }
 0x12c   : > { %v943_v40 = vpop.permute.xlu1 %942 }
 0x12d   : > { %1730 = vmatmul.msk.f32.vlgmr.msra.gmra.mxu0 %vm677_vm1, %v853_v20 }
 0x131   : > { %v701_v21 = vpop.f32.mrf.mxu3 }
 0x132   : > { %v704_v22 = vsel %vm677_vm1, %v701_v21, -inf }
 0x133   : > { %705 = vmax.xlane.f32.xlu0 %v704_v22 }
 0x137   : > { %v674_v37 = vpop.f32.mrf.mxu2 }
 0x138   : > { %v675_v38 = vadd.f32 %v2218_v36, %v674_v37 }
 0x13a   : > { %734 = vmatpush.msrb.mxu3 %v675_v38 }
 0x13c   : > { %847 = vmatpush.msra.mxu3 %v2225_v39 }
 0x1a2   : > { %v764_v27 = vpop.f32.mrf.mxu0 }
 0x1a3   : > { %v767_v28 = vsel %vm677_vm1, %v764_v27, -inf }
 0x1a4   : > { %768 = vmax.xlane.f32.xlu2 %v767_v28 }
 0x1a6   : > { %v706_v29 = vpop.xlane.xlu0 %705 }
 0x1a7   : > { %v707_v30 = vsub.f32 %v701_v21, %v706_v29 }
 0x1a9   : > { %v708_v31 = vmul.f32 1.442695, %v707_v30 }
 0x1aa   : > { %v877_v32 = vpop.f32.mrf.mxu0 }
 0x1ab   : > { %1816 = vpow2.f32 %v708_v31  ;;  %v880_v33 = vsel %vm677_vm1, %v877_v32, -inf }
 0x1ac   : > { %881 = vmax.xlane.f32.xlu1 %v880_v33 }
 0x1b1   : > { %v1817_v34 = vpop.eup %1816 }
 0x1b2   : > { %v710_v35 = vsel %vm677_vm1, %v1817_v34, 0.0 }
 0x1b3   : > { %711 = vadd.xlane.f32.xlu0 %v710_v35 }
 0x1c5   : > { %892 = vrot.lane.b32.xlu1 %v675_v38, %s2466_s0 }
 0x1c7   : > { %944 = vrot.lane.b32.xlu0 %v649_v14, %s2464_s4 }
 0x217   : > { %v769_v41 = vpop.xlane.xlu2 %768 }
 0x218   : > { %v770_v42 = vsub.f32 %v764_v27, %v769_v41 }
 0x21a   : > { %v771_v43 = vmul.f32 1.442695, %v770_v42 }
 0x21c   : > { %1818 = vpow2.f32 %v771_v43 }
 0x21f   : > { %v882_v44 = vpop.xlane.xlu1 %881 }
 0x220   : > { %v883_v45 = vsub.f32 %v877_v32, %v882_v44 }
 0x222   : > { %v1819_v46 = vpop.eup %1818  ;;  %v884_v47 = vmul.f32 1.442695, %v883_v45 }
 0x223   : > { %v773_v48 = vsel %vm677_vm1, %v1819_v46, 0.0 }
 0x224   : > { %1820 = vpow2.f32 %v884_v47  ;;  %774 = vadd.xlane.f32.xlu0 %v773_v48 }
 0x226   : > { %v712_v49 = vpop.xlane.xlu0 %711 }
 0x227   : > { %1822 = vrcp.f32 %v712_v49 }
 0x22a   : > { %v1821_v50 = vpop.eup %1820 }
 0x22b   : > { %v886_v51 = vsel %vm677_vm1, %v1821_v50, 0.0 }
 0x22c   : > { %887 = vadd.xlane.f32.xlu2 %v886_v51 }
 0x22d   : > { %v1823_v52 = vpop.eup %1822 }
 0x22e   : > { %v714_v53 = vmul.f32 %v1823_v52, %v1817_v34 }
 0x230   : > { %1723 = vmatmul.msk.f32.vlgmr.msrb.gmra.mxu3 %vm677_vm1, %v714_v53 }
 0x237   : > { %v893_v63 = vpop.permute.xlu1 %892 }
 0x239   : > { %v945_v54 = vpop.permute.xlu0 %944 }
 0x23a   : > { %1733 = vmatpush.xpose.msk.msrb.mxu3 %vm677_vm1, %v945_v54 }
 0x244   : > { %780 = vrot.lane.b32.xlu2 %v675_v38, %s2468_s21 }
 0x24c   : > { %982 = vrot.lane.b32.xlu2 %v675_v38, %s2464_s4 }
 0x297   : > { %v775_v55 = vpop.xlane.xlu0 %774 }
 0x298   : > { %1824 = vrcp.f32 %v775_v55 }
 0x29e   : > { %v1825_v57 = vpop.eup %1824 }
 0x29f   : > { %v888_v56 = vpop.xlane.xlu2 %887  ;;  %v777_v58 = vmul.f32 %v1825_v57, %v1819_v46 }
 0x2a0   : > { %1826 = vrcp.f32 %v888_v56 }
 0x2a1   : > { %v778_v62 = vadd.f32 %v777_v58, %v714_v53 }
 0x2a6   : > { %v1827_v59 = vpop.eup %1826 }
 0x2a7   : > { %v890_v60 = vmul.f32 %v1827_v59, %v1821_v50  ;;  %v781_v61 = vpop.permute.xlu2 %780 }
 0x2a8   : > { %801 = vmatpush.msrb.mxu1 %v781_v61 }
 0x2a9   : > { %1726 = vmatmul.msk.f32.vlgmr.msrb.gmra.mxu1 %vm677_vm1, %v777_v58  ;;  %v891_v12 = vadd.f32 %v890_v60, %v778_v62 }
 0x2aa   : > { %913 = vmatpush.msra.mxu1 %v893_v63 }
 0x2af   : > { %v983_v13 = vpop.permute.xlu2 %982 }
 0x2b0   : > { %1003 = vmatpush.msrb.mxu0 %v983_v13 }
 0x2b1   : > { %1731 = vmatmul.msk.f32.vlgmr.msra.gmra.mxu1 %vm677_vm1, %v890_v60 }
 0x2b2   : > { %1127 = vmatpush.msra.mxu0 %v2180_v16 }
 0x2b3   : > { %v736_v14 = vpop.f32.mrf.mxu3 }
 0x2b4   : > { %1128 = vmatpush.msra.mxu0 %v2191_v23  ;;  %1728 = vmatmul.msk.f32.vlgmr.msra.gmra.mxu3 %vm677_vm1, %v736_v14 }
 0x2b5   : > { %1107 = vmatpush.msra.mxu3 %v2093_v0  ;;  %v590_v0 = vld [vmem:[%s2467_s6 + $0x10] sm:$0xff] }
 0x2b6   : > { %1129 = vmatpush.msra.mxu0 %v2197_v24  ;;  %936 = vmatpush.msra.mxu2 %v590_v0 }
 0x2b7   : > { %1108 = vmatpush.msra.mxu3 %v2098_v1 }
 0x2b8   : > { %1130 = vmatpush.msra.mxu0 %v2207_v25 }
 0x2b9   : > { %1109 = vmatpush.msra.mxu3 %v2116_v4 }
 0x2bb   : > { %1110 = vmatpush.msra.mxu3 %v2129_v6 }
 0x2bc   : > { %1734 = vmatmul.msk.f32.vlgmr.msrb.gmra.mxu3 %vm677_vm1, %v943_v40 }
 0x2c4   : > { %1738 = vmatmul.msk.f32.vlgmr.msra.gmra.mxu3 %vm601_vm0, %v2152_v9 }
 0x326   : > { %v803_v1 = vpop.f32.mrf.mxu1 }
 0x327   : > { %1727 = vmatmul.msk.f32.vlgmr.msrb.gmra.mxu2 %vm677_vm1, %v803_v1 }
 0x328   : > { %1087 = vmatpush.msrb.mxu2 %v2103_v2 }
 0x32a   : > { %1088 = vmatpush.msrb.mxu2 %v2111_v3 }
 0x32c   : > { %1089 = vmatpush.msrb.mxu2 %v2121_v5 }
 0x32e   : > { %v915_v4 = vpop.f32.mrf.mxu1  ;;  %1090 = vmatpush.msrb.mxu2 %v2136_v7 }
 0x32f   : > { %1732 = vmatmul.msk.f32.vlgmr.msra.gmra.mxu2 %vm677_vm1, %v915_v4 }
 0x337   : > { %v849_v6 = vpop.f32.mrf.mxu3  ;;  %1737 = vmatmul.msk.f32.vlgmr.msrb.gmra.mxu2 %vm601_vm0, %v2144_v8 }
 0x33f   : > { %v967_v16 = vpop.f32.mrf.mxu3 }
 0x340   : > { %v970_v17 = vsel %vm677_vm1, %v967_v16, -inf }
 0x341   : > { %971 = vmax.xlane.f32.xlu0 %v970_v17 }
 0x347   : > { %v1112_v20 = vpop.f32.mrf.mxu3 }
 0x348   : > { %v1113_v21 = vadd.f32 %v2161_v10, %v1112_v20 }
 0x34a   : > { %1198 = vrot.lane.b32.xlu2 %v1113_v21, %s2468_s21 }
 0x352   : > { %1401 = vrot.lane.b32.xlu2 %v1113_v21, %s2464_s4 }
 0x3a4   : > { %v1199_v29 = vpop.permute.xlu2 %1198 }
 0x3a5   : > { %1743 = vmatpush.xpose.msk.msrb.mxu3 %vm677_vm1, %v1199_v29 }
 0x3aa   : > { %v826_v7 = vpop.f32.mrf.mxu2 }
 0x3ab   : > { %v850_v34 = vadd.f32 %v849_v6, %v826_v7 }
 0x3ac   : > { %v1402_v30 = vpop.permute.xlu2 %1401 }
 0x3b2   : > { %v938_v22 = vpop.f32.mrf.mxu2 }
 0x3b3   : > { %v941_v35 = vadd.f32 %v938_v22, %v850_v34 }
 0x3b4   : > { %v972_v18 = vpop.xlane.xlu0 %971 }
 0x3b5   : > { %v973_v19 = vsub.f32 %v967_v16, %v972_v18 }
 0x3b7   : > { %v974_v2 = vmul.f32 1.442695, %v973_v19 }
 0x3b9   : > { %1828 = vpow2.f32 %v974_v2  ;;  %v1813_v2 = vld [vmem:[%s2428_s10] ss:$0 sm:$0xff] }
 0x3ba   : > { %v1092_v23 = vpop.f32.mrf.mxu2 }
 0x3bb   : > { %v1093_v24 = vadd.f32 %v2166_v11, %v1092_v23  ;;  %v2286_v11 = vld [vmem:[%s2467_s6 + $0x18] sm:$0xff] }
 0x3bc   : > { %1026 = vmatpush.msrb.mxu1 %v2286_v11 }
 0x3bd   : > { %1399 = vrot.lane.b32.xlu2 %v1093_v24, %s2464_s4 }
 0x3be   : > { %1740 = vmatpush.xpose.msk.msra.mxu1 %vm677_vm1, %v1113_v21 }
 0x3bf   : > { %v1829_v3 = vpop.eup %1828 }
 0x3c0   : > { %v976_v5 = vsel %vm677_vm1, %v1829_v3, 0.0 }
 0x3c1   : > { %977 = vadd.xlane.f32.xlu0 %v976_v5 }
 0x3c5   : > { %1311 = vrot.lane.b32.xlu2 %v1113_v21, %s2466_s0 }
 0x417   : > { %v1400_v31 = vpop.permute.xlu2 %1399 }
 0x41f   : > { %v1312_v33 = vpop.permute.xlu2 %1311 }
 0x420   : > { %1748 = vmatpush.xpose.msk.msra.mxu3 %vm677_vm1, %v1312_v33  ;;  %v1953_v33 = vmov 32.0  }
 0x434   : > { %v978_v25 = vpop.xlane.xlu0 %977 }
 0x435   : > { %1830 = vrcp.f32 %v978_v25 }
 0x43b   : > { %v1831_v26 = vpop.eup %1830 }
 0x43c   : > { %v980_v10 = vmul.f32 %v1831_v26, %v1829_v3 }
 0x43e   : > { %1735 = vmatmul.msk.f32.vlgmr.msrb.gmra.mxu0 %vm677_vm1, %v980_v10  ;;  %v981_v27 = vadd.f32 %v980_v10, %v891_v12 }
 0x440   : > { %v1074_v28 = vmul.f32 0.25, %v981_v27 }
 0x442   : > { %1524 = vst.msk [vmem:[%s2277_s27] sm:$0xff] %vm677_vm1, %v1074_v28 }
 0x446   : > { %1739 = vmatmul.msk.f32.vlgmr.msra.gmra.mxu0 %vm601_vm0, %v2152_v9 }
 0x4bb   : > { %v1005_v32 = vpop.f32.mrf.mxu0 }
 0x4bc   : > { %1736 = vmatmul.msk.f32.vlgmr.msrb.gmra.mxu1 %vm677_vm1, %v1005_v32 }
 0x4bd   : > { %1281 = vmatpush.msrb.mxu1 %v589_v15 }
 0x4c3   : > { %v1132_v47 = vpop.f32.mrf.mxu0 }
 0x4c4   : > { %1741 = vmatmul.msk.f32.vlgmr.msra.gmra.mxu1 %vm677_vm1, %v1093_v24  ;;  %v1133_v48 = vadd.f32 %v2218_v36, %v1132_v47 }
 0x4c5   : > { %1393 = vmatpush.msra.mxu1 %v590_v0 }
 0x4c6   : > { %1191 = vmatpush.msra.mxu2 %v1133_v48 }
 0x4c8   : > { %1304 = vmatpush.msrb.mxu2 %v2225_v39 }
 0x539   : > { %v1028_v37 = vpop.f32.mrf.mxu1 }
 0x53a   : > { %v2294_v38 = vadd.f32 %v1028_v37, %v941_v35 }
 0x53c   : > { %v1035_v3 = vadd.f32 %v1813_v2, %v2294_v38 }
 0x53e   : > { %v1036_v5 = vadd.f32 %v1035_v3, %v2152_v9 }
 0x540   : > { %v1037_v7 = vsel %vm601_vm0, %v1036_v5, 0.0 }
 0x541   : > { %v1158_v40 = vpop.f32.mrf.mxu1 }
 0x542   : > { %v1161_v41 = vsel %vm677_vm1, %v1158_v40, -inf }
 0x543   : > { %1162 = vmax.xlane.f32.xlu1 %v1161_v41 }
 0x5b6   : > { %v1163_v42 = vpop.xlane.xlu1 %1162 }
 0x5b7   : > { %v1164_v43 = vsub.f32 %v1158_v40, %v1163_v42 }
 0x5b9   : > { %v1165_v44 = vmul.f32 1.442695, %v1164_v43 }
 0x5bb   : > { %1832 = vpow2.f32 %v1165_v44 }
 0x5c1   : > { %v1833_v45 = vpop.eup %1832 }
 0x5c2   : > { %v1167_v46 = vsel %vm677_vm1, %v1833_v45, 0.0 }
 0x5c3   : > { %1168 = vadd.xlane.f32.xlu0 %v1167_v46 }
 0x5d7   : > { %1196 = vrot.lane.b32.xlu0 %v1093_v24, %s2468_s21 }
 0x5df   : > { %1309 = vrot.lane.b32.xlu0 %v1093_v24, %s2466_s0 }
 0x636   : > { %v1169_v49 = vpop.xlane.xlu0 %1168 }
 0x637   : > { %1834 = vrcp.f32 %v1169_v49 }
 0x63d   : > { %v1835_v50 = vpop.eup %1834 }
 0x63e   : > { %v1171_v51 = vmul.f32 %v1835_v50, %v1833_v45 }
 0x640   : > { %1742 = vmatmul.msk.f32.vlgmr.msra.gmra.mxu2 %vm677_vm1, %v1171_v51 }
 0x641   : > { %1752 = vmatpush.xpose.msk.msra.mxu2 %vm677_vm1, %v1402_v30 }
 0x649   : > { %v1197_v52 = vpop.permute.xlu0 %1196 }
 0x64a   : > { %1744 = vmatmul.msk.f32.vlgmr.msrb.gmra.mxu3 %vm677_vm1, %v1197_v52 }
 0x651   : > { %v1310_v53 = vpop.permute.xlu0 %1309 }
 0x652   : > { %1749 = vmatmul.msk.f32.vlgmr.msra.gmra.mxu3 %vm677_vm1, %v1310_v53 }
 0x6c3   : > { %v1193_v54 = vpop.f32.mrf.mxu2 }
 0x6c4   : > { %1747 = vmatmul.msk.f32.vlgmr.msrb.gmra.mxu2 %vm677_vm1, %v1193_v54 }
 0x6cc   : > { %1753 = vmatmul.msk.f32.vlgmr.msra.gmra.mxu2 %vm677_vm1, %v1400_v31 }
 0x6cd   : > { %v1221_v36 = vpop.f32.mrf.mxu3 }
 0x6ce   : > { %v1224_v39 = vsel %vm677_vm1, %v1221_v36, -inf }
 0x6cf   : > { %1225 = vmax.xlane.f32.xlu2 %v1224_v39 }
 0x6d5   : > { %v1334_v55 = vpop.f32.mrf.mxu3 }
 0x6d6   : > { %v1337_v56 = vsel %vm677_vm1, %v1334_v55, -inf }
 0x6d7   : > { %1338 = vmax.xlane.f32.xlu1 %v1337_v56 }
 0x6e7   : > { %1439 = vrot.lane.b32.xlu2 %v1133_v48, %s2464_s4 }
 0x742   : > { %v1226_v57 = vpop.xlane.xlu2 %1225 }
 0x743   : > { %v1227_v58 = vsub.f32 %v1221_v36, %v1226_v57 }
 0x745   : > { %v1228_v59 = vmul.f32 1.442695, %v1227_v58 }
 0x747   : > { %1836 = vpow2.f32 %v1228_v59  ;;  %v2311_v60 = vpop.f32.mrf.mxu2 }
 0x74a   : > { %v1440_v61 = vpop.permute.xlu2 %1439  ;;  %v1339_v62 = vpop.xlane.xlu1 %1338 }
 0x74b   : > { %v1340_v63 = vsub.f32 %v1334_v55, %v1339_v62  ;;  %1460 = vmatpush.msrb.mxu3 %v1440_v61 }
 0x74d   : > { %v1837_v12 = vpop.eup %1836  ;;  %v1341_v13 = vmul.f32 1.442695, %v1340_v63 }
 0x74e   : > { %v1230_v14 = vsel %vm677_vm1, %v1837_v12, 0.0 }
 0x74f   : > { %1838 = vpow2.f32 %v1341_v13  ;;  %v1424_v15 = vpop.f32.mrf.mxu2  ;;  %1231 = vadd.xlane.f32.xlu1 %v1230_v14 }
 0x750   : > { %v1427_v0 = vsel %vm677_vm1, %v1424_v15, -inf }
 0x751   : > { %1428 = vmax.xlane.f32.xlu0 %v1427_v0 }
 0x755   : > { %v1839_v1 = vpop.eup %1838 }
 0x756   : > { %v1343_v4 = vsel %vm677_vm1, %v1839_v1, 0.0 }
 0x757   : > { %1344 = vadd.xlane.f32.xlu1 %v1343_v4 }
 0x765   : > { %1349 = vrot.lane.b32.xlu0 %v1133_v48, %s2466_s0  ;;  %s2328_s0 = scalar_lea.vmem [#allocation5], %s1712_s20  ;;  %s1874_s20 = scalar_lea.hbm %s2433_s15, 16 }
 0x7c2   : > { %v1232_v20 = vpop.xlane.xlu1 %1231 }
 0x7c4   : > { %v1429_v6 = vpop.xlane.xlu0 %1428 }
 0x7c5   : > { %v1430_v16 = vsub.f32 %v1424_v15, %v1429_v6 }
 0x7c7   : > { %v1431_v17 = vmul.f32 1.442695, %v1430_v16 }
 0x7c9   : > { %1840 = vpow2.f32 %v1431_v17 }
 0x7ca   : > { %v1345_v21 = vpop.xlane.xlu1 %1344  ;;  %1842 = vrcp.f32 %v1232_v20 }
 0x7cb   : > { %1844 = vrcp.f32 %v1345_v21 }
 0x7cf   : > { %v1841_v18 = vpop.eup %1840 }
 0x7d0   : > { %v1433_v19 = vsel %vm677_vm1, %v1841_v18, 0.0  ;;  %v1843_v22 = vpop.eup %1842 }
 0x7d1   : > { %1434 = vadd.xlane.f32.xlu1 %v1433_v19  ;;  %v1845_v24 = vpop.eup %1844  ;;  %v1234_v25 = vmul.f32 %v1843_v22, %v1837_v12 }
 0x7d2   : > { %v1347_v26 = vmul.f32 %v1845_v24, %v1839_v1 }
 0x7d3   : > { %v1235_v10 = vadd.f32 %v1234_v25, %v1171_v51 }
 0x7d5   : > { %v1348_v28 = vadd.f32 %v1347_v26, %v1235_v10 }
 0x7d7   : > { %v1350_v32 = vpop.permute.xlu0 %1349 }
 0x7ea   : > { %1237 = vrot.lane.b32.xlu1 %v1133_v48, %s2468_s21  ;;  %s1758_s21 = sshll.u32 %s2063_s13, 3 }
 0x7eb   : > { %s1549_s22 = scalar_lea.hbm %s2433_s15, %s1758_s21  ;;  %s1563_s1 = scalar_lea.hbm %s2434_s16, %s1758_s21 }
 0x7ec   : > { %s1553_s3 = sshll.u32 %s1549_s22, 4  ;;  %s1554_s3 = int_to_ptr.hbm [resolvable:$true] %s1553_s3 }
 0x7ed   : > { %s1868_s6 = sshra.s32 %s1554_s3, 4  ;;  %s1869_s6 = int_to_ptr.hbm [resolvable:$true] %s1868_s6 }
 0x7ee   : > { %s1870_s7 = scalar_lea.hbm %s1869_s6, 8  ;;  %p1875_p0 = scmp.lt.s32.totalorder %s1869_s6, %s2433_s15 }
 0x7ef   : > { %p1871_p11 = scmp.ne.s32.totalorder %s1869_s6, %s1870_s7  ;;  %p1876_p1 = scmp.lt.s32.totalorder %s1874_s20, %s1870_s7 }
 0x7f1   : > { %p1872_p12 = pnand %p1871_p11, %p2080_p5  ;;  %p1877_p2 = por %p1876_p1, %p1875_p0 }
 0x7f3   : > { %p1873_p13 = pneg %p1872_p12 }
 0x7f5   : > { %p1878_p3 = pnand %p1877_p2, %p1873_p13 }
 0x814   : > { %1038 = vadd.xlane.f32.xlu1 %v1037_v7 }
 0x844   : > { %v1435_v23 = vpop.xlane.xlu1 %1434 }
 0x845   : > { %1846 = vrcp.f32 %v1435_v23 }
 0x846   : > { %1848 = vrcp.f32 %v1953_v33 }
 0x84b   : > { %v1847_v27 = vpop.eup %1846 }
 0x84c   : > { %v1437_v29 = vmul.f32 %v1847_v27, %v1841_v18  ;;  %v1849_v34 = vpop.eup %1848 }
 0x84d   : > { %v1041_v35 = vmul.f32 32.0, %v1849_v34  ;;  %vm1045_vm2 = vweird.f32 %v1849_v34 }
 0x84e   : > { %1754 = vmatmul.msk.f32.vlgmr.msrb.gmra.mxu3 %vm677_vm1, %v1437_v29  ;;  %v1438_v9 = vadd.f32 %v1437_v29, %v1348_v28 }
 0x84f   : > { %v1042_v37 = vsub.f32 1.0, %v1041_v35 }
 0x850   : > { %v1515_v30 = vmul.f32 0.25, %v1438_v9 }
 0x851   : > { %v1043_v38 = vmul.f32 %v1849_v34, %v1042_v37 }
 0x852   : > { %1525 = vst.msk [vmem:[%s2328_s0] sm:$0xff] %vm677_vm1, %v1515_v30 }
 0x853   : > { %v1044_v40 = vadd.f32 %v1849_v34, %v1043_v38 }
 0x855   : > { %v2335_v41 = vsel %vm1045_vm2, %v1849_v34, %v1044_v40 }
 0x85c   : > { %v1238_v31 = vpop.permute.xlu1 %1237 }
 0x85d   : > { %1258 = vmatpush.msrb.mxu0 %v1238_v31 }
 0x85e   : > { %1745 = vmatmul.msk.f32.vlgmr.msrb.gmra.mxu0 %vm677_vm1, %v1234_v25 }
 0x85f   : > { %1370 = vmatpush.msra.mxu0 %v1350_v32 }
 0x861   : > { %1483 = vmatpush.msrb.mxu0 %v2286_v11 }
 0x866   : > { %1750 = vmatmul.msk.f32.vlgmr.msra.gmra.mxu0 %vm677_vm1, %v1347_v26 }
 0x887   : > { %v1039_v42 = vpop.xlane.xlu1 %1038 }
 0x888   : > { %v1047_v43 = vmul.f32 %v2335_v41, %v1039_v42 }
 0x88a   : > { %v2338_v44 = vsub.f32 %v1036_v5, %v1047_v43 }
 0x88c   : > { %v1049_v11 = vmul.f32 %v2338_v44, %v2338_v44 }
 0x88e   : > { %v1050_v45 = vsel %vm601_vm0, %v1049_v11, 0.0 }
 0x88f   : > { %1051 = vadd.xlane.f32.xlu2 %v1050_v45 }
 0x8d1   : > { %v1462_v46 = vpop.f32.mrf.mxu3 }
 0x8d2   : > { %1755 = vmatmul.msk.f32.vlgmr.msrb.gmra.mxu0 %vm677_vm1, %v1462_v46 }
 0x8db   : > { %v1260_v47 = vpop.f32.mrf.mxu0 }
 0x8dc   : > { %1746 = vmatmul.msk.f32.vlgmr.msrb.gmra.mxu1 %vm677_vm1, %v1260_v47 }
 0x8e3   : > { %v1372_v48 = vpop.f32.mrf.mxu0 }
 0x8e4   : > { %1751 = vmatmul.msk.f32.vlgmr.msra.gmra.mxu1 %vm677_vm1, %v1372_v48 }
 0x94f   : > { %v1485_v53 = vpop.f32.mrf.mxu0 }
 0x959   : > { %v1283_v49 = vpop.f32.mrf.mxu1 }
 0x95a   : > { %v1307_v50 = vadd.f32 %v2311_v60, %v1283_v49 }
 0x961   : > { %v1395_v51 = vpop.f32.mrf.mxu1 }
 0x962   : > { %v1398_v52 = vadd.f32 %v1395_v51, %v1307_v50 }
 0x964   : > { %v1488_v54 = vadd.f32 %v1485_v53, %v1398_v52 }
 0x966   : > { %v1489_v36 = vadd.f32 %v1813_v2, %v1488_v54 }
 0x968   : > { %v1490_v39 = vadd.f32 %v1489_v36, %v2144_v8 }
 0x96a   : > { %v1491_v55 = vsel %vm601_vm0, %v1490_v39, 0.0 }
 0x96b   : > { %1492 = vadd.xlane.f32.xlu0 %v1491_v55 }
 0x9de   : > { %v1493_v56 = vpop.xlane.xlu0 %1492 }
 0x9df   : > { %v1494_v57 = vmul.f32 %v1493_v56, %v2335_v41 }
 0x9e1   : > { %v2350_v58 = vsub.f32 %v1490_v39, %v1494_v57 }
 0x9e3   : > { %v1496_v59 = vmul.f32 %v2350_v58, %v2350_v58 }
 0x9e5   : > { %v1497_v60 = vsel %vm601_vm0, %v1496_v59, 0.0 }
 0x9e6   : > { %1498 = vadd.xlane.f32.xlu1 %v1497_v60 }
 0x9e7   : > { %1881 = shalt.err (!%p1878_p3)
}
 0x9e8   : > { %1762 = dma.vmem_to_hbm [thread:$0]  (%p2080_p5), %s1552_s2, 128, %s1554_s3, %s1531_s5  }
 0x9e9   : > { %s1565_s27 = sshll.u32 %s2328_s0, 4  ;;  %s1567_s21 = sshll.u32 %s1563_s1, 4  ;;  %s1566_s27 = int_to_ptr.vmem [resolvable:$true] %s1565_s27  ;;  %s1568_s21 = int_to_ptr.hbm [resolvable:$true] %s1567_s21 }
 0x9ea   : > { %s1536_s8 = scalar_lea.sflag [#allocation6], %s2271_s19  ;;  %s1896_s22 = sshra.s32 %s1568_s21, 4  ;;  %s1897_s22 = int_to_ptr.hbm [resolvable:$true] %s1896_s22 }
 0x9eb   : > { %s1898_s4 = scalar_lea.hbm %s1897_s22, 8  ;;  %s1902_s9 = scalar_lea.hbm %s2434_s16, 16 }
 0x9ec   : > { %p1899_p4 = scmp.ne.s32.totalorder %s1897_s22, %s1898_s4  ;;  %p1903_p9 = scmp.lt.s32.totalorder %s1897_s22, %s2434_s16 }
 0x9ed   : > { %p1904_p10 = scmp.lt.s32.totalorder %s1902_s9, %s1898_s4 }
 0x9ee   : > { %p1900_p7 = pnand %p1899_p4, %p2080_p5 }
 0x9ef   : > { %p1905_p11 = por %p1904_p10, %p1903_p9 }
 0x9f0   : > { %p1901_p8 = pneg %p1900_p7 }
 0x9f2   : > { %p1906_p12 = pnand %p1905_p11, %p1901_p8 }
 0x9f4   : > { %1909 = shalt.err (!%p1906_p12)
}
 0x9f5   : > { %1763 = dma.vmem_to_hbm [thread:$0]  (%p2080_p5), %s1566_s27, 128, %s1568_s21, %s1536_s8   ;;  %v1052_v8 = vpop.xlane.xlu2 %1051  ;;  %v1814_v3 = vld [vmem:[%s2429_s11] ss:$0 sm:$0xff] }
 0x9f6   : > { %v1053_v61 = vmul.f32 %v1052_v8, %v2335_v41  ;;  %s1516_s1 = sld [smem:[#allocation2]]  ;;  %v1815_v21 = vld [vmem:[%s2430_s12] ss:$0 sm:$0xff]  ;;  %s572_s29 = scalar_lea.vmem %s2432_s14, %s2131_s30 }
 0x9f8   : > { %v1054_v62 = vadd.f32 1e-05, %v1053_v61 }
 0x9fa   : > { %1850 = vrsqrt.f32 %v1054_v62  ;;  %vm1061_vm4 = vweird.f32 %v1054_v62 }
 0x9fc   : > { %s1519_s19 = ssub.f32 1.0, %s1516_s1  ;;  %v1517_v10 = vstv %s1516_s1 }
 0x9fe   : > { %v1520_v27 = vstv %s1519_s19 }
 0xa00   : > { %v1851_v63 = vpop.eup %1850 }
 0xa01   : > { %v1056_v12 = vmul.f32 %v1851_v63, %v1054_v62  ;;  %vm1062_vm3 = vweird.f32 %v1851_v63 }
 0xa02   : > { %vm1063_vm5 = vmor %vm1061_vm4, %vm1062_vm3 }
 0xa03   : > { %v1057_v13 = vmul.f32 %v1851_v63, %v1056_v12 }
 0xa05   : > { %v1058_v0 = vmul.f32 0.5, %v1057_v13 }
 0xa07   : > { %v1059_v4 = vsub.f32 1.5, %v1058_v0 }
 0xa09   : > { %v1060_v6 = vmul.f32 %v1851_v63, %v1059_v4 }
 0xa0b   : > { %v1064_v18 = vsel %vm1063_vm5, %v1851_v63, %v1060_v6 }
 0xa0c   : > { %v1065_v5 = vmul.f32 %v1064_v18, %v2338_v44 }
 0xa0e   : > { %v1069_v22 = vmul.f32 %v1814_v3, %v1065_v5 }
 0xa10   : > { %v1073_v25 = vadd.f32 %v1815_v21, %v1069_v22 }
 0xa12   : > { %v1518_v29 = vmul.f32 %v1517_v10, %v1073_v25 }
 0xa59   : > { %v1499_v14 = vpop.xlane.xlu1 %1498 }
 0xa5a   : > { %v1500_v15 = vmul.f32 %v1499_v14, %v2335_v41 }
 0xa5c   : > { %v1501_v1 = vadd.f32 1e-05, %v1500_v15 }
 0xa5e   : > { %1852 = vrsqrt.f32 %v1501_v1  ;;  %vm1508_vm7 = vweird.f32 %v1501_v1 }
 0xa64   : > { %v1853_v16 = vpop.eup %1852 }
 0xa65   : > { %v1503_v17 = vmul.f32 %v1853_v16, %v1501_v1  ;;  %vm1509_vm6 = vweird.f32 %v1853_v16 }
 0xa66   : > { %vm1510_vm8 = vmor %vm1508_vm7, %vm1509_vm6 }
 0xa67   : > { %v1504_v19 = vmul.f32 %v1853_v16, %v1503_v17 }
 0xa69   : > { %v1505_v2 = vmul.f32 0.5, %v1504_v19 }
 0xa6b   : > { %v1506_v7 = vsub.f32 1.5, %v1505_v2 }
 0xa6d   : > { %v1507_v20 = vmul.f32 %v1853_v16, %v1506_v7 }
 0xa6f   : > { %v1511_v23 = vsel %vm1510_vm8, %v1853_v16, %v1507_v20 }
 0xa70   : > { %v1512_v24 = vmul.f32 %v1511_v23, %v2350_v58 }
 0xa72   : > { %v1513_v26 = vmul.f32 %v1814_v3, %v1512_v24 }
 0xa74   : > { %v1514_v28 = vadd.f32 %v1815_v21, %v1513_v26 }
 0xa76   : > { %v1521_v9 = vmul.f32 %v1520_v27, %v1514_v28 }
 0xa78   : > { %v1522_v30 = vadd.f32 %v1521_v9, %v1518_v29 }
 0xa7a   : > { %1523 = vst.msk [vmem:[%s572_s29] sm:$0xff] %vm601_vm0, %v1522_v30 }
 0xa7b PF: > { %p1773_p5 = scmp.ge.s32.totalorder %s1948_s26, 2  ;;  %s1586_s27 = sand.u32 1, %s1936_s23  }
 0xa7c   : > { %s1587_s21 = scalar_lea.sflag [#allocation4], %s1586_s27 }
 0xa7d   : > { %p1767_p13 = pnand %p1773_p5, %p2084_p6 }
 0xa7f   : > { %p1768_p0 = pneg %p1767_p13 }
 0xa81   : > { %1927 = dma.done.wait (%p1768_p0), %s1587_s21, 128  }
 0xa82   : > { %1929 = vsyncadd (%p1768_p0), %s1587_s21, 4294967168  ;;  %s1597_s8 = scalar_lea.sflag [#allocation6], %s1586_s27 }
 0xa83   : > { %1931 = dma.done.wait (%p1768_p0), %s1597_s8, 128  }
 0xa84   : > { %1933 = vsyncadd (%p1768_p0), %s1597_s8, 4294967168  ;;  %s2469_s30 = sld [smem:[#allocation9_spill]]  ;;  %p31_p1 = scmp.ge.s32.totalorder %s2067_s28, 4  }
 0xa85   : > { %s2470_s25 = sld [smem:[#allocation10_spill]]  ;;  %s2471_s23 = smov %s1940_s24 }
 0xa86   : > { %s2473_s26 = smov %s2067_s28  ;;  %33 = sbr.rel (!%p31_p1) target bundleno = 17 (0x11), region = 146 }
 0xa8a   : > { %s2472_s24 = smov %s2469_s30 }
 0xa8b   :  { %1603 = vsyncpa [#allocation4], 1 }
 0xa8c   :  { %1605 = vsyncpa [#allocation4 + $0x1], 1 }
 0xa8d   :  { %1606 = vsyncpa [#allocation6], 1 }
 0xa8e   :  { %1608 = vsyncpa [#allocation6 + $0x1], 1 }

</bundles_post_ra>
